<compile_context>
chip_gen: v6e
topology: v6e:2x2x1
jax: 0.10.0
libtpu: 0.0.40
codegen_flags: <defaults>
</compile_context>

<pallas_src>
import jax
import jax.numpy as jnp
from jax.experimental import pallas as pl
from jax.experimental.pallas import tpu as pltpu

LANE = 128


def _round_up(x, m):
    return ((x + m - 1) // m) * m


def make_decoder_kernel(n_layers, hp):
    """Build the single-step decoder kernel.

    Ref layout (all lane-padded, f32):
      inputs : x (B, Ep), h_in (L, B, Hp), c_in (L, B, Hp),
               then per layer l: w_ih_t (in_dim_p, 4*Hp), w_hh_t (Hp, 4*Hp), b (1, 4*Hp),
               then w_fc_t (Hp, Op), b_fc (1, Op)
      outputs: pred (B, Op), h_out (L, B, Hp), c_out (L, B, Hp)
    """
    n_in = 3 + 3 * n_layers + 2

    def kernel(*refs):
        x_ref, h_in_ref, c_in_ref = refs[0], refs[1], refs[2]
        w_refs = refs[3:3 + 3 * n_layers]
        w_fc_ref = refs[3 + 3 * n_layers]
        b_fc_ref = refs[4 + 3 * n_layers]
        pred_ref, h_out_ref, c_out_ref = refs[n_in], refs[n_in + 1], refs[n_in + 2]

        x = x_ref[...]                                   # (B, Ep) layer-0 input
        for l in range(n_layers):                        # static unroll over layers
            w_ih = w_refs[3 * l][...]                    # (in_dim_p, 4*Hp)
            w_hh = w_refs[3 * l + 1][...]                # (Hp, 4*Hp)
            b = w_refs[3 * l + 2][...]                   # (1, 4*Hp)
            h_prev = h_in_ref[l]                         # (B, Hp)
            c_prev = c_in_ref[l]                         # (B, Hp)

            gates = (jnp.dot(x, w_ih, preferred_element_type=jnp.float32)
                     + jnp.dot(h_prev, w_hh, preferred_element_type=jnp.float32)
                     + b)                                # (B, 4*Hp), gates at 128-aligned cols

            i_g = jax.nn.sigmoid(gates[:, 0 * hp:1 * hp])
            f_g = jax.nn.sigmoid(gates[:, 1 * hp:2 * hp])
            g_g = jnp.tanh(gates[:, 2 * hp:3 * hp])
            o_g = jax.nn.sigmoid(gates[:, 3 * hp:4 * hp])

            c_new = f_g * c_prev + i_g * g_g             # padded lanes stay exactly 0
            h_new = o_g * jnp.tanh(c_new)

            h_out_ref[l] = h_new.astype(h_out_ref.dtype)
            c_out_ref[l] = c_new.astype(c_out_ref.dtype)
            # TODO(synk): training-mode inter-layer LSTM dropout would be applied to x here.
            x = h_new                                    # feed next layer

        pred_ref[...] = (jnp.dot(x, w_fc_ref[...], preferred_element_type=jnp.float32)
                         + b_fc_ref[...]).astype(pred_ref.dtype)

    return kernel


def init_decoder_params(key, output_dim, emb_dim, hid_dim, n_layers):
    """Deterministic params mirroring nn.Embedding / nn.LSTM / nn.Linear defaults.

    Weights are stored pre-transposed, gate-blocked and lane-padded (H -> Hp multiple of 128),
    with b = b_ih + b_hh pre-combined, so no per-call weight munging is needed.
    """
    ep = _round_up(emb_dim, LANE)
    hp = _round_up(hid_dim, LANE)
    op = _round_up(output_dim, LANE)

    keys = jax.random.split(key, 3 + 4 * n_layers)
    ki = 0

    # nn.Embedding default init: N(0, 1); pad embedding columns with zeros.
    emb = jax.random.normal(keys[ki], (output_dim, emb_dim), jnp.float32); ki += 1
    emb_p = jnp.zeros((output_dim, ep), jnp.float32).at[:, :emb_dim].set(emb)

    def pad_gates(w_t, in_dim, in_dim_p):
        # w_t: (in_dim, 4H) PyTorch gate order (i,f,g,o)  ->  (in_dim_p, 4*Hp), 128-aligned gates.
        out = jnp.zeros((in_dim_p, 4 * hp), jnp.float32)
        for g in range(4):
            out = out.at[:in_dim, g * hp:g * hp + hid_dim].set(
                w_t[:, g * hid_dim:(g + 1) * hid_dim])
        return out

    s = 1.0 / (hid_dim ** 0.5)  # PyTorch LSTM default U(-1/sqrt(H), 1/sqrt(H))
    lstm = []
    for l in range(n_layers):
        in_dim = emb_dim if l == 0 else hid_dim
        in_dim_p = ep if l == 0 else hp
        w_ih = jax.random.uniform(keys[ki], (4 * hid_dim, in_dim), jnp.float32, -s, s); ki += 1
        w_hh = jax.random.uniform(keys[ki], (4 * hid_dim, hid_dim), jnp.float32, -s, s); ki += 1
        b_ih = jax.random.uniform(keys[ki], (4 * hid_dim,), jnp.float32, -s, s); ki += 1
        b_hh = jax.random.uniform(keys[ki], (4 * hid_dim,), jnp.float32, -s, s); ki += 1
        b = b_ih + b_hh
        b_p = jnp.zeros((1, 4 * hp), jnp.float32)
        for g in range(4):
            b_p = b_p.at[0, g * hp:g * hp + hid_dim].set(b[g * hid_dim:(g + 1) * hid_dim])
        lstm.append({
            "w_ih_t": pad_gates(w_ih.T, in_dim, in_dim_p),
            "w_hh_t": pad_gates(w_hh.T, hid_dim, hp),
            "b": b_p,
        })

    # nn.Linear(hid_dim, output_dim) default init: U(-1/sqrt(hid_dim), 1/sqrt(hid_dim))
    sf = 1.0 / (hid_dim ** 0.5)
    w_fc = jax.random.uniform(keys[ki], (output_dim, hid_dim), jnp.float32, -sf, sf); ki += 1
    b_fc = jax.random.uniform(keys[ki], (output_dim,), jnp.float32, -sf, sf); ki += 1
    w_fc_t = jnp.zeros((hp, op), jnp.float32).at[:hid_dim, :output_dim].set(w_fc.T)
    b_fc_p = jnp.zeros((1, op), jnp.float32).at[0, :output_dim].set(b_fc)

    return {
        "embedding": emb_p, "lstm": lstm, "w_fc_t": w_fc_t, "b_fc": b_fc_p,
        "emb_dim": emb_dim, "emb_dim_p": ep,
        "hid_dim": hid_dim, "hid_dim_p": hp,
        "out_dim": output_dim, "out_dim_p": op,
        "n_layers": n_layers,
    }


def decoder_forward(params, input_tokens, hidden, cell):
    """Equivalent of Decoder.forward(input, hidden, cell) in eval mode.

    input_tokens: (B,) int32 token ids.
    hidden, cell: (n_layers, B, H) float32.
    Returns prediction (B, output_dim), hidden (n_layers, B, H), cell (n_layers, B, H).
    """
    n_layers = params["n_layers"]
    H, Hp = params["hid_dim"], params["hid_dim_p"]
    out_dim, Op = params["out_dim"], params["out_dim_p"]
    B = input_tokens.shape[0]

    # Embedding lookup (tiny gather, done as XLA glue); Dropout(eval) == identity.
    x = params["embedding"][input_tokens]                      # (B, Ep), already lane-padded

    # Pad recurrent state to the lane-aligned width (padded lanes stay zero through the cell).
    h_p = jnp.pad(hidden, ((0, 0), (0, 0), (0, Hp - H)))
    c_p = jnp.pad(cell, ((0, 0), (0, 0), (0, Hp - H)))

    args = [x, h_p, c_p]
    for lyr in params["lstm"]:
        args += [lyr["w_ih_t"], lyr["w_hh_t"], lyr["b"]]
    args += [params["w_fc_t"], params["b_fc"]]

    vmem = pl.BlockSpec(memory_space=pltpu.MemorySpace.VMEM)
    pred_p, h_out_p, c_out_p = pl.pallas_call(
        make_decoder_kernel(n_layers, Hp),
        out_shape=(
            jax.ShapeDtypeStruct((B, Op), jnp.float32),
            jax.ShapeDtypeStruct((n_layers, B, Hp), jnp.float32),
            jax.ShapeDtypeStruct((n_layers, B, Hp), jnp.float32),
        ),
        in_specs=[vmem] * len(args),
        out_specs=(vmem, vmem, vmem),
    )(*args)

    return pred_p[:, :out_dim], h_out_p[:, :, :H], c_out_p[:, :, :H]


def decoder_reference(params, input_tokens, hidden, cell):
    """Pure-JAX reference (same math, unpadded) for correctness checking."""
    H, Hp = params["hid_dim"], params["hid_dim_p"]
    E, V = params["emb_dim"], params["out_dim"]
    x = params["embedding"][input_tokens][:, :E]
    h_list, c_list = [], []
    for l, lyr in enumerate(params["lstm"]):
        in_dim = E if l == 0 else H
        w_ih = jnp.concatenate([lyr["w_ih_t"][:in_dim, g * Hp:g * Hp + H] for g in range(4)], 1)
        w_hh = jnp.concatenate([lyr["w_hh_t"][:H, g * Hp:g * Hp + H] for g in range(4)], 1)
        b = jnp.concatenate([lyr["b"][0, g * Hp:g * Hp + H] for g in range(4)])
        gates = x @ w_ih + hidden[l] @ w_hh + b
        i = jax.nn.sigmoid(gates[:, 0 * H:1 * H])
        f = jax.nn.sigmoid(gates[:, 1 * H:2 * H])
        g = jnp.tanh(gates[:, 2 * H:3 * H])
        o = jax.nn.sigmoid(gates[:, 3 * H:4 * H])
        c_new = f * cell[l] + i * g
        h_new = o * jnp.tanh(c_new)
        h_list.append(h_new)
        c_list.append(c_new)
        x = h_new
    pred = x @ params["w_fc_t"][:H, :V] + params["b_fc"][0, :V]
    return pred, jnp.stack(h_list), jnp.stack(c_list)


if __name__ == "__main__":
    OUTPUT_DIM = 16   # target vocabulary size
    EMB_DIM = 32
    HID_DIM = 32
    N_LAYERS = 2
    B = 2

    key = jax.random.PRNGKey(0)
    k_params, k_tok, k_h, k_c = jax.random.split(key, 4)

    params = init_decoder_params(k_params, OUTPUT_DIM, EMB_DIM, HID_DIM, N_LAYERS)
    input_tokens = jax.random.randint(k_tok, (B,), 0, OUTPUT_DIM, dtype=jnp.int32)
    hidden = jax.random.normal(k_h, (N_LAYERS, B, HID_DIM), jnp.float32)
    cell = jax.random.normal(k_c, (N_LAYERS, B, HID_DIM), jnp.float32)

    prediction, hidden_out, cell_out = decoder_forward(params, input_tokens, hidden, cell)
    jax.block_until_ready((prediction, hidden_out, cell_out))

    assert prediction.shape == (B, OUTPUT_DIM), prediction.shape
    assert hidden_out.shape == (N_LAYERS, B, HID_DIM), hidden_out.shape
    assert cell_out.shape == (N_LAYERS, B, HID_DIM), cell_out.shape

    pred_ref, h_ref, c_ref = decoder_reference(params, input_tokens, hidden, cell)
    assert jnp.allclose(prediction, pred_ref, atol=1e-3, rtol=1e-3)
    assert jnp.allclose(hidden_out, h_ref, atol=1e-3, rtol=1e-3)
    assert jnp.allclose(cell_out, c_ref, atol=1e-3, rtol=1e-3)

    print("KERNEL_OK")
</pallas_src>

<mosaic_0001>
module attributes {stable_mosaic.version = 11 : i64} {
  func.func @kernel(%arg0: memref<2x128xf32, #tpu.memory_space<vmem>>, %arg1: memref<2x2x128xf32, #tpu.memory_space<vmem>>, %arg2: memref<2x2x128xf32, #tpu.memory_space<vmem>>, %arg3: memref<128x512xf32, #tpu.memory_space<vmem>>, %arg4: memref<128x512xf32, #tpu.memory_space<vmem>>, %arg5: memref<1x512xf32, #tpu.memory_space<vmem>>, %arg6: memref<128x512xf32, #tpu.memory_space<vmem>>, %arg7: memref<128x512xf32, #tpu.memory_space<vmem>>, %arg8: memref<1x512xf32, #tpu.memory_space<vmem>>, %arg9: memref<128x128xf32, #tpu.memory_space<vmem>>, %arg10: memref<1x128xf32, #tpu.memory_space<vmem>>, %arg11: memref<2x128xf32, #tpu.memory_space<vmem>>, %arg12: memref<2x2x128xf32, #tpu.memory_space<vmem>>, %arg13: memref<2x2x128xf32, #tpu.memory_space<vmem>>) attributes {dimension_semantics = [], scalar_prefetch = 0 : i64, scratch_operands = 0 : i64, tpu.core_type = #tpu.core_type<tc>} {
    %c0 = arith.constant 0 : index
    %c0_0 = arith.constant 0 : index
    %0 = vector.load %arg0[%c0, %c0_0] : memref<2x128xf32, #tpu.memory_space<vmem>>, vector<2x128xf32>
    %c0_1 = arith.constant 0 : index
    %c0_2 = arith.constant 0 : index
    %1 = vector.load %arg3[%c0_1, %c0_2] : memref<128x512xf32, #tpu.memory_space<vmem>>, vector<128x512xf32>
    %c0_3 = arith.constant 0 : index
    %c0_4 = arith.constant 0 : index
    %2 = vector.load %arg4[%c0_3, %c0_4] : memref<128x512xf32, #tpu.memory_space<vmem>>, vector<128x512xf32>
    %c0_5 = arith.constant 0 : index
    %c0_6 = arith.constant 0 : index
    %3 = vector.load %arg5[%c0_5, %c0_6] : memref<1x512xf32, #tpu.memory_space<vmem>>, vector<1x512xf32>
    %c0_7 = arith.constant 0 : index
    %c0_8 = arith.constant 0 : index
    %c0_9 = arith.constant 0 : index
    %4 = vector.load %arg1[%c0_7, %c0_8, %c0_9] : memref<2x2x128xf32, #tpu.memory_space<vmem>>, vector<1x2x128xf32>
    %5 = vector.shape_cast %4 : vector<1x2x128xf32> to vector<2x128xf32>
    %c0_10 = arith.constant 0 : index
    %c0_11 = arith.constant 0 : index
    %c0_12 = arith.constant 0 : index
    %6 = vector.load %arg2[%c0_10, %c0_11, %c0_12] : memref<2x2x128xf32, #tpu.memory_space<vmem>>, vector<1x2x128xf32>
    %7 = vector.shape_cast %6 : vector<1x2x128xf32> to vector<2x128xf32>
    %cst = arith.constant dense<0.000000e+00> : vector<2x512xf32>
    %8 = tpu.matmul %0, %1, %cst {dimension_numbers = #tpu.dot_dimension_numbers<[1], [0], [0], [1], [0, 0, 1, 1], [], []>} : vector<2x128xf32>, vector<128x512xf32>, vector<2x512xf32> -> vector<2x512xf32>
    %cst_13 = arith.constant dense<0.000000e+00> : vector<2x512xf32>
    %9 = tpu.matmul %5, %2, %cst_13 {dimension_numbers = #tpu.dot_dimension_numbers<[1], [0], [0], [1], [0, 0, 1, 1], [], []>} : vector<2x128xf32>, vector<128x512xf32>, vector<2x512xf32> -> vector<2x512xf32>
    %10 = arith.addf %8, %9 : vector<2x512xf32>
    %11 = vector.broadcast %3 : vector<1x512xf32> to vector<2x512xf32>
    %12 = arith.addf %10, %11 : vector<2x512xf32>
    %13 = vector.extract_strided_slice %12 {offsets = [0, 0], sizes = [2, 128], strides = [1, 1]} : vector<2x512xf32> to vector<2x128xf32>
    %14 = arith.negf %13 : vector<2x128xf32>
    %15 = math.exp %14 : vector<2x128xf32>
    %cst_14 = arith.constant 1.000000e+00 : f32
    %16 = vector.broadcast %cst_14 : f32 to vector<2x128xf32>
    %17 = arith.addf %16, %15 : vector<2x128xf32>
    %18 = arith.divf %16, %17 : vector<2x128xf32>
    %19 = vector.extract_strided_slice %12 {offsets = [0, 128], sizes = [2, 128], strides = [1, 1]} : vector<2x512xf32> to vector<2x128xf32>
    %20 = arith.negf %19 : vector<2x128xf32>
    %21 = math.exp %20 : vector<2x128xf32>
    %cst_15 = arith.constant 1.000000e+00 : f32
    %22 = vector.broadcast %cst_15 : f32 to vector<2x128xf32>
    %23 = arith.addf %22, %21 : vector<2x128xf32>
    %24 = arith.divf %22, %23 : vector<2x128xf32>
    %25 = vector.extract_strided_slice %12 {offsets = [0, 256], sizes = [2, 128], strides = [1, 1]} : vector<2x512xf32> to vector<2x128xf32>
    %26 = math.tanh %25 : vector<2x128xf32>
    %27 = vector.extract_strided_slice %12 {offsets = [0, 384], sizes = [2, 128], strides = [1, 1]} : vector<2x512xf32> to vector<2x128xf32>
    %28 = arith.negf %27 : vector<2x128xf32>
    %29 = math.exp %28 : vector<2x128xf32>
    %cst_16 = arith.constant 1.000000e+00 : f32
    %30 = vector.broadcast %cst_16 : f32 to vector<2x128xf32>
    %31 = arith.addf %30, %29 : vector<2x128xf32>
    %32 = arith.divf %30, %31 : vector<2x128xf32>
    %33 = arith.mulf %24, %7 : vector<2x128xf32>
    %34 = arith.mulf %18, %26 : vector<2x128xf32>
    %35 = arith.addf %33, %34 : vector<2x128xf32>
    %36 = math.tanh %35 : vector<2x128xf32>
    %37 = arith.mulf %32, %36 : vector<2x128xf32>
    %c0_17 = arith.constant 0 : index
    %c0_18 = arith.constant 0 : index
    %c0_19 = arith.constant 0 : index
    %38 = vector.load %arg12[%c0_17, %c0_18, %c0_19] : memref<2x2x128xf32, #tpu.memory_space<vmem>>, vector<1x2x128xf32>
    %39 = vector.shape_cast %38 : vector<1x2x128xf32> to vector<2x128xf32>
    %40 = vector.shape_cast %37 : vector<2x128xf32> to vector<1x2x128xf32>
    tpu.vector_store %arg12[%c0_17, %c0_18, %c0_19], %40 {strides = array<i32>} : memref<2x2x128xf32, #tpu.memory_space<vmem>>, vector<1x2x128xf32>,
    %c0_20 = arith.constant 0 : index
    %c0_21 = arith.constant 0 : index
    %c0_22 = arith.constant 0 : index
    %41 = vector.load %arg13[%c0_20, %c0_21, %c0_22] : memref<2x2x128xf32, #tpu.memory_space<vmem>>, vector<1x2x128xf32>
    %42 = vector.shape_cast %41 : vector<1x2x128xf32> to vector<2x128xf32>
    %43 = vector.shape_cast %35 : vector<2x128xf32> to vector<1x2x128xf32>
    tpu.vector_store %arg13[%c0_20, %c0_21, %c0_22], %43 {strides = array<i32>} : memref<2x2x128xf32, #tpu.memory_space<vmem>>, vector<1x2x128xf32>,
    %c0_23 = arith.constant 0 : index
    %c0_24 = arith.constant 0 : index
    %44 = vector.load %arg6[%c0_23, %c0_24] : memref<128x512xf32, #tpu.memory_space<vmem>>, vector<128x512xf32>
    %c0_25 = arith.constant 0 : index
    %c0_26 = arith.constant 0 : index
    %45 = vector.load %arg7[%c0_25, %c0_26] : memref<128x512xf32, #tpu.memory_space<vmem>>, vector<128x512xf32>
    %c0_27 = arith.constant 0 : index
    %c0_28 = arith.constant 0 : index
    %46 = vector.load %arg8[%c0_27, %c0_28] : memref<1x512xf32, #tpu.memory_space<vmem>>, vector<1x512xf32>
    %c1 = arith.constant 1 : index
    %c0_29 = arith.constant 0 : index
    %c0_30 = arith.constant 0 : index
    %47 = vector.load %arg1[%c1, %c0_29, %c0_30] : memref<2x2x128xf32, #tpu.memory_space<vmem>>, vector<1x2x128xf32>
    %48 = vector.shape_cast %47 : vector<1x2x128xf32> to vector<2x128xf32>
    %c1_31 = arith.constant 1 : index
    %c0_32 = arith.constant 0 : index
    %c0_33 = arith.constant 0 : index
    %49 = vector.load %arg2[%c1_31, %c0_32, %c0_33] : memref<2x2x128xf32, #tpu.memory_space<vmem>>, vector<1x2x128xf32>
    %50 = vector.shape_cast %49 : vector<1x2x128xf32> to vector<2x128xf32>
    %cst_34 = arith.constant dense<0.000000e+00> : vector<2x512xf32>
    %51 = tpu.matmul %37, %44, %cst_34 {dimension_numbers = #tpu.dot_dimension_numbers<[1], [0], [0], [1], [0, 0, 1, 1], [], []>} : vector<2x128xf32>, vector<128x512xf32>, vector<2x512xf32> -> vector<2x512xf32>
    %cst_35 = arith.constant dense<0.000000e+00> : vector<2x512xf32>
    %52 = tpu.matmul %48, %45, %cst_35 {dimension_numbers = #tpu.dot_dimension_numbers<[1], [0], [0], [1], [0, 0, 1, 1], [], []>} : vector<2x128xf32>, vector<128x512xf32>, vector<2x512xf32> -> vector<2x512xf32>
    %53 = arith.addf %51, %52 : vector<2x512xf32>
    %54 = vector.broadcast %46 : vector<1x512xf32> to vector<2x512xf32>
    %55 = arith.addf %53, %54 : vector<2x512xf32>
    %56 = vector.extract_strided_slice %55 {offsets = [0, 0], sizes = [2, 128], strides = [1, 1]} : vector<2x512xf32> to vector<2x128xf32>
    %57 = arith.negf %56 : vector<2x128xf32>
    %58 = math.exp %57 : vector<2x128xf32>
    %cst_36 = arith.constant 1.000000e+00 : f32
    %59 = vector.broadcast %cst_36 : f32 to vector<2x128xf32>
    %60 = arith.addf %59, %58 : vector<2x128xf32>
    %61 = arith.divf %59, %60 : vector<2x128xf32>
    %62 = vector.extract_strided_slice %55 {offsets = [0, 128], sizes = [2, 128], strides = [1, 1]} : vector<2x512xf32> to vector<2x128xf32>
    %63 = arith.negf %62 : vector<2x128xf32>
    %64 = math.exp %63 : vector<2x128xf32>
    %cst_37 = arith.constant 1.000000e+00 : f32
    %65 = vector.broadcast %cst_37 : f32 to vector<2x128xf32>
    %66 = arith.addf %65, %64 : vector<2x128xf32>
    %67 = arith.divf %65, %66 : vector<2x128xf32>
    %68 = vector.extract_strided_slice %55 {offsets = [0, 256], sizes = [2, 128], strides = [1, 1]} : vector<2x512xf32> to vector<2x128xf32>
    %69 = math.tanh %68 : vector<2x128xf32>
    %70 = vector.extract_strided_slice %55 {offsets = [0, 384], sizes = [2, 128], strides = [1, 1]} : vector<2x512xf32> to vector<2x128xf32>
    %71 = arith.negf %70 : vector<2x128xf32>
    %72 = math.exp %71 : vector<2x128xf32>
    %cst_38 = arith.constant 1.000000e+00 : f32
    %73 = vector.broadcast %cst_38 : f32 to vector<2x128xf32>
    %74 = arith.addf %73, %72 : vector<2x128xf32>
    %75 = arith.divf %73, %74 : vector<2x128xf32>
    %76 = arith.mulf %67, %50 : vector<2x128xf32>
    %77 = arith.mulf %61, %69 : vector<2x128xf32>
    %78 = arith.addf %76, %77 : vector<2x128xf32>
    %79 = math.tanh %78 : vector<2x128xf32>
    %80 = arith.mulf %75, %79 : vector<2x128xf32>
    %c1_39 = arith.constant 1 : index
    %c0_40 = arith.constant 0 : index
    %c0_41 = arith.constant 0 : index
    %81 = vector.load %arg12[%c1_39, %c0_40, %c0_41] : memref<2x2x128xf32, #tpu.memory_space<vmem>>, vector<1x2x128xf32>
    %82 = vector.shape_cast %81 : vector<1x2x128xf32> to vector<2x128xf32>
    %83 = vector.shape_cast %80 : vector<2x128xf32> to vector<1x2x128xf32>
    tpu.vector_store %arg12[%c1_39, %c0_40, %c0_41], %83 {strides = array<i32>} : memref<2x2x128xf32, #tpu.memory_space<vmem>>, vector<1x2x128xf32>,
    %c1_42 = arith.constant 1 : index
    %c0_43 = arith.constant 0 : index
    %c0_44 = arith.constant 0 : index
    %84 = vector.load %arg13[%c1_42, %c0_43, %c0_44] : memref<2x2x128xf32, #tpu.memory_space<vmem>>, vector<1x2x128xf32>
    %85 = vector.shape_cast %84 : vector<1x2x128xf32> to vector<2x128xf32>
    %86 = vector.shape_cast %78 : vector<2x128xf32> to vector<1x2x128xf32>
    tpu.vector_store %arg13[%c1_42, %c0_43, %c0_44], %86 {strides = array<i32>} : memref<2x2x128xf32, #tpu.memory_space<vmem>>, vector<1x2x128xf32>,
    %c0_45 = arith.constant 0 : index
    %c0_46 = arith.constant 0 : index
    %87 = vector.load %arg9[%c0_45, %c0_46] : memref<128x128xf32, #tpu.memory_space<vmem>>, vector<128x128xf32>
    %cst_47 = arith.constant dense<0.000000e+00> : vector<2x128xf32>
    %88 = tpu.matmul %80, %87, %cst_47 {dimension_numbers = #tpu.dot_dimension_numbers<[1], [0], [0], [1], [0, 0, 1, 1], [], []>} : vector<2x128xf32>, vector<128x128xf32>, vector<2x128xf32> -> vector<2x128xf32>
    %c0_48 = arith.constant 0 : index
    %c0_49 = arith.constant 0 : index
    %89 = vector.load %arg10[%c0_48, %c0_49] : memref<1x128xf32, #tpu.memory_space<vmem>>, vector<1x128xf32>
    %90 = vector.broadcast %89 : vector<1x128xf32> to vector<2x128xf32>
    %91 = arith.addf %88, %90 : vector<2x128xf32>
    %c0_50 = arith.constant 0 : index
    %c0_51 = arith.constant 0 : index
    %92 = vector.load %arg11[%c0_50, %c0_51] : memref<2x128xf32, #tpu.memory_space<vmem>>, vector<2x128xf32>
    tpu.vector_store %arg11[%c0_50, %c0_51], %91 {strides = array<i32>} : memref<2x128xf32, #tpu.memory_space<vmem>>, vector<2x128xf32>,
    return
  }
}

</mosaic_0001>

<bundles_post_ra>
// kernel: tpu_custom_call.1
= control target key start
LH: loop header
LB: loop body
LE: loop exit
PB: predicated region body
PF: predicated region fallthrough
CT: control target
= control target key end

     0   :  { %19 = vsyncpa [#allocation3], 0  ;;  %s1775_s0 = inlined_call_operand.hbm [shape: f32[2,128], index: 0, kind: input, shape index: {}]   ;;  %s1776_s1 = inlined_call_operand.hbm [shape: f32[2,2,128], index: 1, kind: input, shape index: {}]   ;;  %s1777_s2 = inlined_call_operand.hbm [shape: f32[2,2,128], index: 2, kind: input, shape index: {}]   ;;  %s1778_s3 = inlined_call_operand.hbm [shape: f32[128,512], index: 3, kind: input, shape index: {}]   ;;  %s1779_s4 = inlined_call_operand.hbm [shape: f32[128,512], index: 4, kind: input, shape index: {}]   ;;  %s1780_s5 = inlined_call_operand.vmem [shape: f32[1,512], index: 5, kind: input, shape index: {}]   ;;  %s1781_s6 = inlined_call_operand.hbm [shape: f32[128,512], index: 6, kind: input, shape index: {}]   ;;  %s1782_s7 = inlined_call_operand.hbm [shape: f32[128,512], index: 7, kind: input, shape index: {}]   ;;  %s1783_s8 = inlined_call_operand.vmem [shape: f32[1,512], index: 8, kind: input, shape index: {}]   ;;  %s1784_s9 = inlined_call_operand.hbm [shape: f32[128,128], index: 9, kind: input, shape index: {}]   ;;  %s1785_s10 = inlined_call_operand.vmem [shape: f32[1,128], index: 10, kind: input, shape index: {}]   ;;  %s1786_s11 = inlined_call_operand.hbm [shape: f32[2,128], index: 11, kind: output, shape index: {0}]   ;;  %s1787_s12 = inlined_call_operand.hbm [shape: f32[2,2,128], index: 12, kind: output, shape index: {1}]   ;;  %s1788_s13 = inlined_call_operand.hbm [shape: f32[2,2,128], index: 13, kind: output, shape index: {2}]  }
   0x1   :  { %20 = vsyncpa [#allocation6], 0 }
   0x2   :  { %21 = vsyncpa [#allocation9], 0 }
   0x3   :  { %22 = vsyncpa [#allocation12], 0 }
   0x4   :  { %23 = vsyncpa [#allocation15], 0 }
   0x5   :  { %24 = vsyncpa [#allocation4], 0 }
   0x6   :  { %25 = vsyncpa [#allocation18], 0  ;;  %s1574_s25 = smov [#allocation5]  }
   0x7   :  { %s41_s26 = sshll.u32 %s1574_s25, 4  ;;  %s42_s26 = int_to_ptr.vmem [resolvable:$true] %s41_s26 }
   0x8   :  { %s1348_s27 = scalar_lea.vmem %s42_s26, 64  ;;  %p1353_p1 = scmp.lt.s32.totalorder %s42_s26, %s42_s26 }
   0x9   :  { %p1349_p0 = scmp.ne.s32.totalorder %s42_s26, %s1348_s27  ;;  %p1354_p2 = scmp.lt.s32.totalorder %s1348_s27, %s1348_s27 }
   0xb   :  { %p1355_p3 = por %p1354_p2, %p1353_p1 }
   0xd   :  { %p1356_p4 = pnand %p1355_p3, %p1349_p0 }
   0xf   :  { %1359 = shalt.err (!%p1356_p4)
}
  0x10   :  { %s1575_s28 = smov 32   ;;  %s1576_s29 = smov 2  }
  0x11   :  { %47 = dma.hbm_to_vmem [thread:$0]  %s1776_s1, 64, %s42_s26, [#allocation6], %s1575_s28, %s1575_s28, %s1576_s29  }
  0x12   :  { %s1577_s15 = smov [#allocation8]  }
  0x13   :  { %s65_s16 = sshll.u32 %s1577_s15, 4  ;;  %s66_s16 = int_to_ptr.vmem [resolvable:$true] %s65_s16 }
  0x14   :  { %s1368_s17 = scalar_lea.vmem %s66_s16, 8192  ;;  %p1373_p6 = scmp.lt.s32.totalorder %s66_s16, %s66_s16 }
  0x15   :  { %p1369_p5 = scmp.ne.s32.totalorder %s66_s16, %s1368_s17  ;;  %p1374_p7 = scmp.lt.s32.totalorder %s1368_s17, %s1368_s17 }
  0x17   :  { %p1375_p8 = por %p1374_p7, %p1373_p6 }
  0x19   :  { %p1376_p9 = pnand %p1375_p8, %p1369_p5 }
  0x1b   :  { %1379 = shalt.err (!%p1376_p9)
}
  0x1c   :  { %s1578_s18 = smov 512   ;;  %s1579_s21 = smov [#allocation11]  }
  0x1d   :  { %71 = dma.hbm_to_vmem [thread:$0]  %s1778_s3, 8192, %s66_s16, [#allocation9], %s1578_s18, %s1578_s18, %s1575_s28  }
  0x1e   :  { %s91_s1 = sshll.u32 %s1579_s21, 4  ;;  %s1580_s22 = smov [#allocation2]   ;;  %s92_s1 = int_to_ptr.vmem [resolvable:$true] %s91_s1 }
  0x1f   :  { %s32_s23 = sshll.u32 %s1580_s22, 4  ;;  %s1388_s24 = scalar_lea.vmem %s92_s1, 8192  ;;  %s33_s23 = int_to_ptr.vmem [resolvable:$true] %s32_s23 }
  0x20   :  { %p1389_p10 = scmp.ne.s32.totalorder %s92_s1, %s1388_s24  ;;  %p1393_p11 = scmp.lt.s32.totalorder %s92_s1, %s92_s1 }
  0x21   :  { %p1394_p12 = scmp.lt.s32.totalorder %s1388_s24, %s1388_s24 }
  0x23   :  { %p1395_p13 = por %p1394_p12, %p1393_p11 }
  0x25   :  { %p1396_p0 = pnand %p1395_p13, %p1389_p10 }
  0x27   :  { %1399 = shalt.err (!%p1396_p0)
}
  0x28   :  { %97 = dma.hbm_to_vmem [thread:$0]  %s1781_s6, 8192, %s92_s1, [#allocation12], %s1578_s18, %s1578_s18, %s1575_s28  }
  0x29   :  { %s1408_s3 = scalar_lea.vmem %s33_s23, 32  ;;  %p1413_p2 = scmp.lt.s32.totalorder %s33_s23, %s33_s23 }
  0x2a   :  { %p1409_p1 = scmp.ne.s32.totalorder %s33_s23, %s1408_s3  ;;  %p1414_p3 = scmp.lt.s32.totalorder %s1408_s3, %s1408_s3 }
  0x2c   :  { %p1415_p4 = por %p1414_p3, %p1413_p2 }
  0x2e   :  { %p1416_p5 = pnand %p1415_p4, %p1409_p1 }
  0x30   :  { %1419 = shalt.err (!%p1416_p5)
}
  0x31   :  { %35 = dma.hbm_to_vmem [thread:$0]  %s1775_s0, 32, %s33_s23, [#allocation3]  }
  0x32   :  { %s1581_s14 = smov [#allocation7]   ;;  %s1582_s16 = smov [#allocation10]  }
  0x33   :  { %s53_s15 = sshll.u32 %s1581_s14, 4  ;;  %s77_s17 = sshll.u32 %s1582_s16, 4  ;;  %s54_s15 = int_to_ptr.vmem [resolvable:$true] %s53_s15  ;;  %s78_s17 = int_to_ptr.vmem [resolvable:$true] %s77_s17 }
  0x34   :  { %s1428_s19 = scalar_lea.vmem %s54_s15, 64  ;;  %p1433_p7 = scmp.lt.s32.totalorder %s54_s15, %s54_s15 }
  0x35   :  { %p1429_p6 = scmp.ne.s32.totalorder %s54_s15, %s1428_s19  ;;  %p1434_p8 = scmp.lt.s32.totalorder %s1428_s19, %s1428_s19 }
  0x37   :  { %p1435_p9 = por %p1434_p8, %p1433_p7 }
  0x39   :  { %p1436_p10 = pnand %p1435_p9, %p1429_p6 }
  0x3b   :  { %1439 = shalt.err (!%p1436_p10)
}
  0x3c   :  { %59 = dma.hbm_to_vmem [thread:$0]  %s1777_s2, 64, %s54_s15, [#allocation6], %s1575_s28, %s1575_s28, %s1576_s29  }
  0x3d   :  { %s1448_s0 = scalar_lea.vmem %s78_s17, 8192  ;;  %p1453_p12 = scmp.lt.s32.totalorder %s78_s17, %s78_s17 }
  0x3e   :  { %p1449_p11 = scmp.ne.s32.totalorder %s78_s17, %s1448_s0  ;;  %p1454_p13 = scmp.lt.s32.totalorder %s1448_s0, %s1448_s0 }
  0x40   :  { %p1455_p0 = por %p1454_p13, %p1453_p12 }
  0x42   :  { %p1456_p1 = pnand %p1455_p0, %p1449_p11 }
  0x44   :  { %1459 = shalt.err (!%p1456_p1)
}
  0x45   :  { %83 = dma.hbm_to_vmem [thread:$0]  %s1779_s4, 8192, %s78_s17, [#allocation9], %s1578_s18, %s1578_s18, %s1575_s28  }
  0x46   :  { %s1583_s22 = smov [#allocation13]   ;;  %s1584_s24 = smov [#allocation14]  }
  0x47   :  { %s103_s23 = sshll.u32 %s1583_s22, 4  ;;  %s117_s2 = sshll.u32 %s1584_s24, 4  ;;  %s104_s23 = int_to_ptr.vmem [resolvable:$true] %s103_s23  ;;  %s118_s2 = int_to_ptr.vmem [resolvable:$true] %s117_s2 }
  0x48   :  { %s1468_s25 = scalar_lea.vmem %s104_s23, 8192  ;;  %p1473_p3 = scmp.lt.s32.totalorder %s104_s23, %s104_s23 }
  0x49   :  { %p1469_p2 = scmp.ne.s32.totalorder %s104_s23, %s1468_s25  ;;  %p1474_p4 = scmp.lt.s32.totalorder %s1468_s25, %s1468_s25 }
  0x4b   :  { %p1475_p5 = por %p1474_p4, %p1473_p3 }
  0x4d   :  { %p1476_p6 = pnand %p1475_p5, %p1469_p2 }
  0x4f   :  { %1479 = shalt.err (!%p1476_p6)
}
  0x50   :  { %109 = dma.hbm_to_vmem [thread:$0]  %s1782_s7, 8192, %s104_s23, [#allocation12], %s1578_s18, %s1578_s18, %s1575_s28  }
  0x51   :  { %s1488_s4 = scalar_lea.vmem %s118_s2, 2048  ;;  %p1493_p8 = scmp.lt.s32.totalorder %s118_s2, %s118_s2 }
  0x52   :  { %p1489_p7 = scmp.ne.s32.totalorder %s118_s2, %s1488_s4  ;;  %p1494_p9 = scmp.lt.s32.totalorder %s1488_s4, %s1488_s4 }
  0x54   :  { %p1495_p10 = por %p1494_p9, %p1493_p8 }
  0x56   :  { %p1496_p11 = pnand %p1495_p10, %p1489_p7 }
  0x58   :  { %1499 = shalt.err (!%p1496_p11)
}
  0x59   :  { %s1585_s27 = smov 128   ;;  %s1586_s30 = smov 8  }
  0x5a   :  { %123 = dma.hbm_to_vmem [thread:$0]  %s1784_s9, 2048, %s118_s2, [#allocation15], %s1585_s27, %s1585_s27, %s1586_s30  }
  0x5b   :  { %1560 = dma.done.wait [#allocation3], 32  }
  0x5c   :  { %1561 = vsyncadd [#allocation3], 4294967264 }
  0x5d   :  { %1562 = dma.done.wait [#allocation6], 128  }
  0x5e   :  { %1563 = vsyncadd [#allocation6], 4294967168 }
  0x5f   :  { %1564 = dma.done.wait [#allocation9], 16384  }
  0x60   :  { %1565 = vsyncadd [#allocation9], 4294950912 }
  0x61   :  { %1566 = dma.done.wait [#allocation12], 16384  }
  0x62   :  { %1567 = vsyncadd [#allocation12], 4294950912 }
  0x63   :  { %1568 = dma.done.wait [#allocation15], 2048  }
  0x64   :  { %1569 = vsyncadd [#allocation15], 4294965248  ;;  %v1587_v0 = vmov 0.0   ;;  %v276_v1 = vld [vmem:[#allocation10 + $0x1e8] sm:$0xff]  ;;  %v278_v2 = vld [vmem:[#allocation10 + $0x1f8] sm:$0xff]  ;;  %vm1588_vm0 = vmmov 0  }
  0x65   :  { %346 = vmatprep.mubr.f32.mxu0 %v1587_v0  ;;  %417 = vmatprep.mubr.f32.mxu1 %v1587_v0  ;;  %v275_v3 = vld [vmem:[#allocation10 + $0x1e0] sm:$0xff]  ;;  %v277_v4 = vld [vmem:[#allocation10 + $0x1f0] sm:$0xff]  ;;  %v272_v5 = vld [vmem:[#allocation10 + $0x1c8] sm:$0xff] }
  0x66   :  { %282 = vmatprep.subr.mxu0 %v276_v1  ;;  %353 = vmatprep.subr.mxu1 %v278_v2  ;;  %v274_v6 = vld [vmem:[#allocation10 + $0x1d8] sm:$0xff]  ;;  %v271_v7 = vld [vmem:[#allocation10 + $0x1c0] sm:$0xff]  ;;  %v273_v8 = vld [vmem:[#allocation10 + $0x1d0] sm:$0xff] }
  0x67   :  { %283 = vmatpush1.msra.mxu0 %v275_v3  ;;  %354 = vmatpush1.msra.mxu1 %v277_v4  ;;  %v268_v9 = vld [vmem:[#allocation10 + $0x1a8] sm:$0xff]  ;;  %v270_v10 = vld [vmem:[#allocation10 + $0x1b8] sm:$0xff]  ;;  %v267_v11 = vld [vmem:[#allocation10 + $0x1a0] sm:$0xff] }
  0x68   :  { %284 = vmatprep.subr.mxu0 %v272_v5  ;;  %355 = vmatprep.subr.mxu1 %v274_v6  ;;  %v269_v12 = vld [vmem:[#allocation10 + $0x1b0] sm:$0xff]  ;;  %v264_v13 = vld [vmem:[#allocation10 + $0x188] sm:$0xff]  ;;  %v266_v14 = vld [vmem:[#allocation10 + $0x198] sm:$0xff] }
  0x69   :  { %285 = vmatpush1.msra.mxu0 %v271_v7  ;;  %356 = vmatpush1.msra.mxu1 %v273_v8  ;;  %v263_v15 = vld [vmem:[#allocation10 + $0x180] sm:$0xff]  ;;  %v265_v16 = vld [vmem:[#allocation10 + $0x190] sm:$0xff]  ;;  %v260_v17 = vld [vmem:[#allocation10 + $0x168] sm:$0xff] }
  0x6a   :  { %286 = vmatprep.subr.mxu0 %v268_v9  ;;  %357 = vmatprep.subr.mxu1 %v270_v10  ;;  %v262_v18 = vld [vmem:[#allocation10 + $0x178] sm:$0xff]  ;;  %v259_v19 = vld [vmem:[#allocation10 + $0x160] sm:$0xff]  ;;  %v261_v20 = vld [vmem:[#allocation10 + $0x170] sm:$0xff] }
  0x6b   :  { %287 = vmatpush1.msra.mxu0 %v267_v11  ;;  %358 = vmatpush1.msra.mxu1 %v269_v12  ;;  %v256_v21 = vld [vmem:[#allocation10 + $0x148] sm:$0xff]  ;;  %v258_v22 = vld [vmem:[#allocation10 + $0x158] sm:$0xff]  ;;  %v255_v23 = vld [vmem:[#allocation10 + $0x140] sm:$0xff] }
  0x6c   :  { %288 = vmatprep.subr.mxu0 %v264_v13  ;;  %359 = vmatprep.subr.mxu1 %v266_v14  ;;  %v257_v24 = vld [vmem:[#allocation10 + $0x150] sm:$0xff]  ;;  %v252_v25 = vld [vmem:[#allocation10 + $0x128] sm:$0xff]  ;;  %v254_v26 = vld [vmem:[#allocation10 + $0x138] sm:$0xff] }
  0x6d   :  { %289 = vmatpush1.msra.mxu0 %v263_v15  ;;  %360 = vmatpush1.msra.mxu1 %v265_v16  ;;  %v251_v27 = vld [vmem:[#allocation10 + $0x120] sm:$0xff]  ;;  %v253_v28 = vld [vmem:[#allocation10 + $0x130] sm:$0xff]  ;;  %v248_v29 = vld [vmem:[#allocation10 + $0x108] sm:$0xff] }
  0x6e   :  { %290 = vmatprep.subr.mxu0 %v260_v17  ;;  %361 = vmatprep.subr.mxu1 %v262_v18  ;;  %v250_v30 = vld [vmem:[#allocation10 + $0x118] sm:$0xff]  ;;  %v247_v31 = vld [vmem:[#allocation10 + $0x100] sm:$0xff]  ;;  %v249_v32 = vld [vmem:[#allocation10 + $0x110] sm:$0xff] }
  0x6f   :  { %291 = vmatpush1.msra.mxu0 %v259_v19  ;;  %362 = vmatpush1.msra.mxu1 %v261_v20  ;;  %v244_v33 = vld [vmem:[#allocation10 + $0xe8] sm:$0xff]  ;;  %v246_v34 = vld [vmem:[#allocation10 + $0xf8] sm:$0xff]  ;;  %v243_v35 = vld [vmem:[#allocation10 + $0xe0] sm:$0xff] }
  0x70   :  { %292 = vmatprep.subr.mxu0 %v256_v21  ;;  %363 = vmatprep.subr.mxu1 %v258_v22  ;;  %v245_v36 = vld [vmem:[#allocation10 + $0xf0] sm:$0xff]  ;;  %v240_v37 = vld [vmem:[#allocation10 + $0xc8] sm:$0xff]  ;;  %v242_v38 = vld [vmem:[#allocation10 + $0xd8] sm:$0xff] }
  0x71   :  { %293 = vmatpush1.msra.mxu0 %v255_v23  ;;  %364 = vmatpush1.msra.mxu1 %v257_v24  ;;  %v239_v39 = vld [vmem:[#allocation10 + $0xc0] sm:$0xff]  ;;  %v241_v40 = vld [vmem:[#allocation10 + $0xd0] sm:$0xff]  ;;  %v236_v41 = vld [vmem:[#allocation10 + $0xa8] sm:$0xff] }
  0x72   :  { %294 = vmatprep.subr.mxu0 %v252_v25  ;;  %365 = vmatprep.subr.mxu1 %v254_v26  ;;  %v238_v42 = vld [vmem:[#allocation10 + $0xb8] sm:$0xff]  ;;  %v235_v43 = vld [vmem:[#allocation10 + $0xa0] sm:$0xff]  ;;  %v237_v44 = vld [vmem:[#allocation10 + $0xb0] sm:$0xff] }
  0x73   :  { %295 = vmatpush1.msra.mxu0 %v251_v27  ;;  %366 = vmatpush1.msra.mxu1 %v253_v28  ;;  %v232_v45 = vld [vmem:[#allocation10 + $0x88] sm:$0xff]  ;;  %v234_v46 = vld [vmem:[#allocation10 + $0x98] sm:$0xff]  ;;  %v231_v47 = vld [vmem:[#allocation10 + $0x80] sm:$0xff] }
  0x74   :  { %296 = vmatprep.subr.mxu0 %v248_v29  ;;  %367 = vmatprep.subr.mxu1 %v250_v30  ;;  %v233_v48 = vld [vmem:[#allocation10 + $0x90] sm:$0xff]  ;;  %v228_v49 = vld [vmem:[#allocation10 + $0x68] sm:$0xff]  ;;  %v230_v50 = vld [vmem:[#allocation10 + $0x78] sm:$0xff] }
  0x75   :  { %297 = vmatpush1.msra.mxu0 %v247_v31  ;;  %368 = vmatpush1.msra.mxu1 %v249_v32  ;;  %v227_v51 = vld [vmem:[#allocation10 + $0x60] sm:$0xff]  ;;  %v229_v52 = vld [vmem:[#allocation10 + $0x70] sm:$0xff]  ;;  %v224_v53 = vld [vmem:[#allocation10 + $0x48] sm:$0xff] }
  0x76   :  { %298 = vmatprep.subr.mxu0 %v244_v33  ;;  %369 = vmatprep.subr.mxu1 %v246_v34  ;;  %v226_v54 = vld [vmem:[#allocation10 + $0x58] sm:$0xff]  ;;  %v223_v55 = vld [vmem:[#allocation10 + $0x40] sm:$0xff]  ;;  %v225_v56 = vld [vmem:[#allocation10 + $0x50] sm:$0xff] }
  0x77   :  { %299 = vmatpush1.msra.mxu0 %v243_v35  ;;  %370 = vmatpush1.msra.mxu1 %v245_v36  ;;  %v220_v57 = vld [vmem:[#allocation10 + $0x28] sm:$0xff]  ;;  %v222_v58 = vld [vmem:[#allocation10 + $0x38] sm:$0xff]  ;;  %v219_v59 = vld [vmem:[#allocation10 + $0x20] sm:$0xff] }
  0x78   :  { %300 = vmatprep.subr.mxu0 %v240_v37  ;;  %371 = vmatprep.subr.mxu1 %v242_v38  ;;  %v221_v60 = vld [vmem:[#allocation10 + $0x30] sm:$0xff]  ;;  %v216_v61 = vld [vmem:[#allocation10 + $0x8] sm:$0xff]  ;;  %v218_v62 = vld [vmem:[#allocation10 + $0x18] sm:$0xff] }
  0x79   :  { %301 = vmatpush1.msra.mxu0 %v239_v39  ;;  %372 = vmatpush1.msra.mxu1 %v241_v40  ;;  %v215_v63 = vld [vmem:[#allocation10] sm:$0xff]  ;;  %v217_v1 = vld [vmem:[#allocation10 + $0x10] sm:$0xff]  ;;  %v280_v2 = vld [vmem:[#allocation5] sm:$0x3] }
  0x7a   :  { %302 = vmatprep.subr.mxu0 %v236_v41  ;;  %373 = vmatprep.subr.mxu1 %v238_v42  ;;  %v212_v3 = vld [vmem:[#allocation8 + $0x1e8] sm:$0xff]  ;;  %v214_v4 = vld [vmem:[#allocation8 + $0x1f8] sm:$0xff]  ;;  %v211_v5 = vld [vmem:[#allocation8 + $0x1e0] sm:$0xff] }
  0x7b   :  { %303 = vmatpush1.msra.mxu0 %v235_v43  ;;  %374 = vmatpush1.msra.mxu1 %v237_v44  ;;  %v213_v6 = vld [vmem:[#allocation8 + $0x1f0] sm:$0xff]  ;;  %v208_v7 = vld [vmem:[#allocation8 + $0x1c8] sm:$0xff]  ;;  %v210_v8 = vld [vmem:[#allocation8 + $0x1d8] sm:$0xff] }
  0x7c   :  { %304 = vmatprep.subr.mxu0 %v232_v45  ;;  %375 = vmatprep.subr.mxu1 %v234_v46  ;;  %v207_v9 = vld [vmem:[#allocation8 + $0x1c0] sm:$0xff]  ;;  %v209_v10 = vld [vmem:[#allocation8 + $0x1d0] sm:$0xff]  ;;  %v204_v11 = vld [vmem:[#allocation8 + $0x1a8] sm:$0xff] }
  0x7d   :  { %305 = vmatpush1.msra.mxu0 %v231_v47  ;;  %376 = vmatpush1.msra.mxu1 %v233_v48  ;;  %v206_v12 = vld [vmem:[#allocation8 + $0x1b8] sm:$0xff]  ;;  %v203_v13 = vld [vmem:[#allocation8 + $0x1a0] sm:$0xff]  ;;  %v205_v14 = vld [vmem:[#allocation8 + $0x1b0] sm:$0xff] }
  0x7e   :  { %306 = vmatprep.subr.mxu0 %v228_v49  ;;  %377 = vmatprep.subr.mxu1 %v230_v50  ;;  %v200_v15 = vld [vmem:[#allocation8 + $0x188] sm:$0xff]  ;;  %v202_v16 = vld [vmem:[#allocation8 + $0x198] sm:$0xff]  ;;  %v199_v17 = vld [vmem:[#allocation8 + $0x180] sm:$0xff] }
  0x7f   :  { %307 = vmatpush1.msra.mxu0 %v227_v51  ;;  %378 = vmatpush1.msra.mxu1 %v229_v52  ;;  %v201_v18 = vld [vmem:[#allocation8 + $0x190] sm:$0xff]  ;;  %v196_v19 = vld [vmem:[#allocation8 + $0x168] sm:$0xff]  ;;  %v198_v20 = vld [vmem:[#allocation8 + $0x178] sm:$0xff] }
  0x80   :  { %308 = vmatprep.subr.mxu0 %v224_v53  ;;  %379 = vmatprep.subr.mxu1 %v226_v54  ;;  %v195_v21 = vld [vmem:[#allocation8 + $0x160] sm:$0xff]  ;;  %v197_v22 = vld [vmem:[#allocation8 + $0x170] sm:$0xff]  ;;  %v192_v23 = vld [vmem:[#allocation8 + $0x148] sm:$0xff] }
  0x81   :  { %309 = vmatpush1.msra.mxu0 %v223_v55  ;;  %380 = vmatpush1.msra.mxu1 %v225_v56  ;;  %v194_v24 = vld [vmem:[#allocation8 + $0x158] sm:$0xff]  ;;  %v191_v25 = vld [vmem:[#allocation8 + $0x140] sm:$0xff]  ;;  %v193_v26 = vld [vmem:[#allocation8 + $0x150] sm:$0xff] }
  0x82   :  { %310 = vmatprep.subr.mxu0 %v220_v57  ;;  %381 = vmatprep.subr.mxu1 %v222_v58  ;;  %v188_v27 = vld [vmem:[#allocation8 + $0x128] sm:$0xff]  ;;  %v190_v28 = vld [vmem:[#allocation8 + $0x138] sm:$0xff]  ;;  %v187_v29 = vld [vmem:[#allocation8 + $0x120] sm:$0xff] }
  0x83   :  { %311 = vmatpush1.msra.mxu0 %v219_v59  ;;  %382 = vmatpush1.msra.mxu1 %v221_v60  ;;  %v189_v30 = vld [vmem:[#allocation8 + $0x130] sm:$0xff]  ;;  %v184_v31 = vld [vmem:[#allocation8 + $0x108] sm:$0xff]  ;;  %v186_v32 = vld [vmem:[#allocation8 + $0x118] sm:$0xff] }
  0x84   :  { %312 = vmatprep.subr.mxu0 %v216_v61  ;;  %383 = vmatprep.subr.mxu1 %v218_v62  ;;  %v183_v33 = vld [vmem:[#allocation8 + $0x100] sm:$0xff]  ;;  %v185_v34 = vld [vmem:[#allocation8 + $0x110] sm:$0xff]  ;;  %v180_v35 = vld [vmem:[#allocation8 + $0xe8] sm:$0xff] }
  0x85   :  { %313 = vmatpush1.msra.mxu0 %v215_v63  ;;  %384 = vmatpush1.msra.mxu1 %v217_v1  ;;  %v182_v36 = vld [vmem:[#allocation8 + $0xf8] sm:$0xff]  ;;  %v179_v37 = vld [vmem:[#allocation8 + $0xe0] sm:$0xff]  ;;  %v181_v38 = vld [vmem:[#allocation8 + $0xf0] sm:$0xff] }
  0x86   :  { %347 = vmatmul.mubr.f32.vlgmr.msra.gmra.mxu0 %v280_v2  ;;  %424 = vmatprep.subr.mxu0 %v212_v3  ;;  %v176_v39 = vld [vmem:[#allocation8 + $0xc8] sm:$0xff]  ;;  %v178_v40 = vld [vmem:[#allocation8 + $0xd8] sm:$0xff]  ;;  %v175_v41 = vld [vmem:[#allocation8 + $0xc0] sm:$0xff] }
  0x87   :  { %495 = vmatprep.subr.mxu1 %v214_v4  ;;  %418 = vmatmul.mubr.f32.vlgmr.msra.gmra.mxu1 %v280_v2  ;;  %v177_v42 = vld [vmem:[#allocation8 + $0xd0] sm:$0xff]  ;;  %v172_v43 = vld [vmem:[#allocation8 + $0xa8] sm:$0xff]  ;;  %v174_v44 = vld [vmem:[#allocation8 + $0xb8] sm:$0xff] }
  0x88   :  { %425 = vmatpush1.msra.mxu0 %v211_v5  ;;  %496 = vmatpush1.msra.mxu1 %v213_v6  ;;  %v171_v45 = vld [vmem:[#allocation8 + $0xa0] sm:$0xff]  ;;  %v173_v46 = vld [vmem:[#allocation8 + $0xb0] sm:$0xff]  ;;  %v168_v47 = vld [vmem:[#allocation8 + $0x88] sm:$0xff] }
  0x89   :  { %426 = vmatprep.subr.mxu0 %v208_v7  ;;  %497 = vmatprep.subr.mxu1 %v210_v8  ;;  %v170_v48 = vld [vmem:[#allocation8 + $0x98] sm:$0xff]  ;;  %v167_v49 = vld [vmem:[#allocation8 + $0x80] sm:$0xff]  ;;  %v169_v50 = vld [vmem:[#allocation8 + $0x90] sm:$0xff] }
  0x8a   :  { %427 = vmatpush1.msra.mxu0 %v207_v9  ;;  %498 = vmatpush1.msra.mxu1 %v209_v10  ;;  %v164_v51 = vld [vmem:[#allocation8 + $0x68] sm:$0xff]  ;;  %v166_v52 = vld [vmem:[#allocation8 + $0x78] sm:$0xff]  ;;  %v163_v53 = vld [vmem:[#allocation8 + $0x60] sm:$0xff] }
  0x8b   :  { %428 = vmatprep.subr.mxu0 %v204_v11  ;;  %499 = vmatprep.subr.mxu1 %v206_v12  ;;  %v165_v54 = vld [vmem:[#allocation8 + $0x70] sm:$0xff]  ;;  %v160_v55 = vld [vmem:[#allocation8 + $0x48] sm:$0xff]  ;;  %v162_v56 = vld [vmem:[#allocation8 + $0x58] sm:$0xff] }
  0x8c   :  { %429 = vmatpush1.msra.mxu0 %v203_v13  ;;  %500 = vmatpush1.msra.mxu1 %v205_v14  ;;  %v159_v57 = vld [vmem:[#allocation8 + $0x40] sm:$0xff]  ;;  %v161_v58 = vld [vmem:[#allocation8 + $0x50] sm:$0xff]  ;;  %v156_v59 = vld [vmem:[#allocation8 + $0x28] sm:$0xff] }
  0x8d   :  { %430 = vmatprep.subr.mxu0 %v200_v15  ;;  %501 = vmatprep.subr.mxu1 %v202_v16  ;;  %v158_v60 = vld [vmem:[#allocation8 + $0x38] sm:$0xff]  ;;  %v155_v61 = vld [vmem:[#allocation8 + $0x20] sm:$0xff]  ;;  %v157_v62 = vld [vmem:[#allocation8 + $0x30] sm:$0xff] }
  0x8e   :  { %431 = vmatpush1.msra.mxu0 %v199_v17  ;;  %502 = vmatpush1.msra.mxu1 %v201_v18  ;;  %v152_v63 = vld [vmem:[#allocation8 + $0x8] sm:$0xff]  ;;  %v154_v1 = vld [vmem:[#allocation8 + $0x18] sm:$0xff]  ;;  %v151_v2 = vld [vmem:[#allocation8] sm:$0xff] }
  0x8f   :  { %432 = vmatprep.subr.mxu0 %v196_v19  ;;  %503 = vmatprep.subr.mxu1 %v198_v20  ;;  %v153_v3 = vld [vmem:[#allocation8 + $0x10] sm:$0xff]  ;;  %v742_v5 = vld [vmem:[#allocation13 + $0x1e8] sm:$0xff]  ;;  %v741_v6 = vld [vmem:[#allocation13 + $0x1e0] sm:$0xff] }
  0x90   :  { %433 = vmatpush1.msra.mxu0 %v195_v21  ;;  %504 = vmatpush1.msra.mxu1 %v197_v22  ;;  %v150_v4 = vld [vmem:[#allocation2] sm:$0x3]  ;;  %v744_v7 = vld [vmem:[#allocation13 + $0x1f8] sm:$0xff]  ;;  %v738_v8 = vld [vmem:[#allocation13 + $0x1c8] sm:$0xff] }
  0x91   :  { %434 = vmatprep.subr.mxu0 %v192_v23  ;;  %505 = vmatprep.subr.mxu1 %v194_v24  ;;  %v743_v9 = vld [vmem:[#allocation13 + $0x1f0] sm:$0xff]  ;;  %v737_v10 = vld [vmem:[#allocation13 + $0x1c0] sm:$0xff]  ;;  %v740_v11 = vld [vmem:[#allocation13 + $0x1d8] sm:$0xff] }
  0x92   :  { %435 = vmatpush1.msra.mxu0 %v191_v25  ;;  %506 = vmatpush1.msra.mxu1 %v193_v26  ;;  %v734_v12 = vld [vmem:[#allocation13 + $0x1a8] sm:$0xff]  ;;  %v739_v13 = vld [vmem:[#allocation13 + $0x1d0] sm:$0xff]  ;;  %v733_v14 = vld [vmem:[#allocation13 + $0x1a0] sm:$0xff] }
  0x93   :  { %436 = vmatprep.subr.mxu0 %v188_v27  ;;  %507 = vmatprep.subr.mxu1 %v190_v28  ;;  %v736_v15 = vld [vmem:[#allocation13 + $0x1b8] sm:$0xff]  ;;  %v730_v16 = vld [vmem:[#allocation13 + $0x188] sm:$0xff]  ;;  %v735_v17 = vld [vmem:[#allocation13 + $0x1b0] sm:$0xff] }
  0x94   :  { %437 = vmatpush1.msra.mxu0 %v187_v29  ;;  %508 = vmatpush1.msra.mxu1 %v189_v30  ;;  %v729_v18 = vld [vmem:[#allocation13 + $0x180] sm:$0xff]  ;;  %v732_v19 = vld [vmem:[#allocation13 + $0x198] sm:$0xff]  ;;  %v726_v20 = vld [vmem:[#allocation13 + $0x168] sm:$0xff] }
  0x95   :  { %438 = vmatprep.subr.mxu0 %v184_v31  ;;  %509 = vmatprep.subr.mxu1 %v186_v32  ;;  %v731_v21 = vld [vmem:[#allocation13 + $0x190] sm:$0xff]  ;;  %v725_v22 = vld [vmem:[#allocation13 + $0x160] sm:$0xff]  ;;  %v728_v23 = vld [vmem:[#allocation13 + $0x178] sm:$0xff] }
  0x96   :  { %439 = vmatpush1.msra.mxu0 %v183_v33  ;;  %510 = vmatpush1.msra.mxu1 %v185_v34  ;;  %v722_v24 = vld [vmem:[#allocation13 + $0x148] sm:$0xff]  ;;  %v727_v25 = vld [vmem:[#allocation13 + $0x170] sm:$0xff]  ;;  %v721_v26 = vld [vmem:[#allocation13 + $0x140] sm:$0xff] }
  0x97   :  { %440 = vmatprep.subr.mxu0 %v180_v35  ;;  %511 = vmatprep.subr.mxu1 %v182_v36  ;;  %v724_v27 = vld [vmem:[#allocation13 + $0x158] sm:$0xff]  ;;  %v718_v28 = vld [vmem:[#allocation13 + $0x128] sm:$0xff]  ;;  %v723_v29 = vld [vmem:[#allocation13 + $0x150] sm:$0xff] }
  0x98   :  { %441 = vmatpush1.msra.mxu0 %v179_v37  ;;  %512 = vmatpush1.msra.mxu1 %v181_v38  ;;  %v717_v30 = vld [vmem:[#allocation13 + $0x120] sm:$0xff]  ;;  %v720_v31 = vld [vmem:[#allocation13 + $0x138] sm:$0xff]  ;;  %v714_v32 = vld [vmem:[#allocation13 + $0x108] sm:$0xff] }
  0x99   :  { %442 = vmatprep.subr.mxu0 %v176_v39  ;;  %513 = vmatprep.subr.mxu1 %v178_v40  ;;  %v719_v33 = vld [vmem:[#allocation13 + $0x130] sm:$0xff]  ;;  %v713_v34 = vld [vmem:[#allocation13 + $0x100] sm:$0xff]  ;;  %v716_v35 = vld [vmem:[#allocation13 + $0x118] sm:$0xff] }
  0x9a   :  { %443 = vmatpush1.msra.mxu0 %v175_v41  ;;  %514 = vmatpush1.msra.mxu1 %v177_v42  ;;  %v710_v36 = vld [vmem:[#allocation13 + $0xe8] sm:$0xff]  ;;  %v715_v37 = vld [vmem:[#allocation13 + $0x110] sm:$0xff]  ;;  %v709_v38 = vld [vmem:[#allocation13 + $0xe0] sm:$0xff] }
  0x9b   :  { %444 = vmatprep.subr.mxu0 %v172_v43  ;;  %515 = vmatprep.subr.mxu1 %v174_v44  ;;  %v712_v39 = vld [vmem:[#allocation13 + $0xf8] sm:$0xff]  ;;  %v706_v40 = vld [vmem:[#allocation13 + $0xc8] sm:$0xff]  ;;  %v711_v41 = vld [vmem:[#allocation13 + $0xf0] sm:$0xff] }
  0x9c   :  { %445 = vmatpush1.msra.mxu0 %v171_v45  ;;  %516 = vmatpush1.msra.mxu1 %v173_v46  ;;  %v705_v42 = vld [vmem:[#allocation13 + $0xc0] sm:$0xff]  ;;  %v708_v43 = vld [vmem:[#allocation13 + $0xd8] sm:$0xff]  ;;  %v702_v44 = vld [vmem:[#allocation13 + $0xa8] sm:$0xff] }
  0x9d   :  { %446 = vmatprep.subr.mxu0 %v168_v47  ;;  %517 = vmatprep.subr.mxu1 %v170_v48  ;;  %v707_v45 = vld [vmem:[#allocation13 + $0xd0] sm:$0xff]  ;;  %v701_v46 = vld [vmem:[#allocation13 + $0xa0] sm:$0xff]  ;;  %v704_v47 = vld [vmem:[#allocation13 + $0xb8] sm:$0xff] }
  0x9e   :  { %447 = vmatpush1.msra.mxu0 %v167_v49  ;;  %518 = vmatpush1.msra.mxu1 %v169_v50  ;;  %v698_v48 = vld [vmem:[#allocation13 + $0x88] sm:$0xff]  ;;  %v703_v49 = vld [vmem:[#allocation13 + $0xb0] sm:$0xff]  ;;  %v697_v50 = vld [vmem:[#allocation13 + $0x80] sm:$0xff] }
  0x9f   :  { %448 = vmatprep.subr.mxu0 %v164_v51  ;;  %519 = vmatprep.subr.mxu1 %v166_v52  ;;  %v700_v51 = vld [vmem:[#allocation13 + $0x98] sm:$0xff]  ;;  %v694_v52 = vld [vmem:[#allocation13 + $0x68] sm:$0xff] }
  0xa0   :  { %449 = vmatpush1.msra.mxu0 %v163_v53  ;;  %520 = vmatpush1.msra.mxu1 %v165_v54  ;;  %v699_v53 = vld [vmem:[#allocation13 + $0x90] sm:$0xff]  ;;  %v693_v54 = vld [vmem:[#allocation13 + $0x60] sm:$0xff] }
  0xa1   :  { %450 = vmatprep.subr.mxu0 %v160_v55  ;;  %521 = vmatprep.subr.mxu1 %v162_v56  ;;  %v696_v55 = vld [vmem:[#allocation13 + $0x78] sm:$0xff]  ;;  %v690_v56 = vld [vmem:[#allocation13 + $0x48] sm:$0xff] }
  0xa2   :  { %451 = vmatpush1.msra.mxu0 %v159_v57  ;;  %522 = vmatpush1.msra.mxu1 %v161_v58  ;;  %v695_v57 = vld [vmem:[#allocation13 + $0x70] sm:$0xff]  ;;  %v689_v58 = vld [vmem:[#allocation13 + $0x40] sm:$0xff] }
  0xa3   :  { %452 = vmatprep.subr.mxu0 %v156_v59  ;;  %523 = vmatprep.subr.mxu1 %v158_v60  ;;  %v692_v59 = vld [vmem:[#allocation13 + $0x58] sm:$0xff]  ;;  %v686_v60 = vld [vmem:[#allocation13 + $0x28] sm:$0xff] }
  0xa4   :  { %453 = vmatpush1.msra.mxu0 %v155_v61  ;;  %524 = vmatpush1.msra.mxu1 %v157_v62  ;;  %v691_v61 = vld [vmem:[#allocation13 + $0x50] sm:$0xff]  ;;  %v685_v62 = vld [vmem:[#allocation13 + $0x20] sm:$0xff] }
  0xa5   :  { %454 = vmatprep.subr.mxu0 %v152_v63  ;;  %525 = vmatprep.subr.mxu1 %v154_v1  ;;  %v688_v63 = vld [vmem:[#allocation13 + $0x38] sm:$0xff]  ;;  %v682_v1 = vld [vmem:[#allocation13 + $0x8] sm:$0xff] }
  0xa6   :  { %455 = vmatpush1.msra.mxu0 %v151_v2  ;;  %488 = vmatprep.mubr.f32.mxu0 %v1587_v0  ;;  %v687_v2 = vld [vmem:[#allocation13 + $0x30] sm:$0xff] }
  0xa7   :  { %526 = vmatpush1.msra.mxu1 %v153_v3  ;;  %559 = vmatprep.mubr.f32.mxu1 %v1587_v0  ;;  %v681_v3 = vld [vmem:[#allocation13] sm:$0xff] }
  0xa8   :  { %489 = vmatmul.mubr.f32.vlgmr.msra.gmra.mxu0 %v150_v4  ;;  %560 = vmatmul.mubr.f32.vlgmr.msra.gmra.mxu1 %v150_v4  ;;  %v684_v4 = vld [vmem:[#allocation13 + $0x18] sm:$0xff] }
  0xa9   :  { %814 = vmatprep.mubr.f32.mxu0 %v1587_v0  ;;  %885 = vmatprep.mubr.f32.mxu1 %v1587_v0 }
  0xaa   :  { %750 = vmatprep.subr.mxu0 %v742_v5  ;;  %821 = vmatprep.subr.mxu1 %v744_v7  ;;  %v747_v5 = vld [vmem:[#allocation5 + $0x2] sm:$0x3]  ;;  %v678_v7 = vld [vmem:[#allocation11 + $0x1e8] sm:$0xff] }
  0xab   :  { %751 = vmatpush1.msra.mxu0 %v741_v6  ;;  %822 = vmatpush1.msra.mxu1 %v743_v9  ;;  %v683_v6 = vld [vmem:[#allocation13 + $0x10] sm:$0xff]  ;;  %v677_v9 = vld [vmem:[#allocation11 + $0x1e0] sm:$0xff] }
  0xac   :  { %752 = vmatprep.subr.mxu0 %v738_v8  ;;  %823 = vmatprep.subr.mxu1 %v740_v11  ;;  %v680_v8 = vld [vmem:[#allocation11 + $0x1f8] sm:$0xff]  ;;  %v674_v11 = vld [vmem:[#allocation11 + $0x1c8] sm:$0xff] }
  0xad   :  { %753 = vmatpush1.msra.mxu0 %v737_v10  ;;  %824 = vmatpush1.msra.mxu1 %v739_v13  ;;  %v679_v10 = vld [vmem:[#allocation11 + $0x1f0] sm:$0xff]  ;;  %v673_v13 = vld [vmem:[#allocation11 + $0x1c0] sm:$0xff] }
  0xae   :  { %754 = vmatprep.subr.mxu0 %v734_v12  ;;  %825 = vmatprep.subr.mxu1 %v736_v15  ;;  %v676_v12 = vld [vmem:[#allocation11 + $0x1d8] sm:$0xff]  ;;  %v670_v15 = vld [vmem:[#allocation11 + $0x1a8] sm:$0xff] }
  0xaf   :  { %755 = vmatpush1.msra.mxu0 %v733_v14  ;;  %826 = vmatpush1.msra.mxu1 %v735_v17  ;;  %v675_v14 = vld [vmem:[#allocation11 + $0x1d0] sm:$0xff]  ;;  %v669_v17 = vld [vmem:[#allocation11 + $0x1a0] sm:$0xff] }
  0xb0   :  { %756 = vmatprep.subr.mxu0 %v730_v16  ;;  %827 = vmatprep.subr.mxu1 %v732_v19  ;;  %v672_v16 = vld [vmem:[#allocation11 + $0x1b8] sm:$0xff]  ;;  %v666_v19 = vld [vmem:[#allocation11 + $0x188] sm:$0xff] }
  0xb1   :  { %757 = vmatpush1.msra.mxu0 %v729_v18  ;;  %828 = vmatpush1.msra.mxu1 %v731_v21  ;;  %v671_v18 = vld [vmem:[#allocation11 + $0x1b0] sm:$0xff]  ;;  %v665_v21 = vld [vmem:[#allocation11 + $0x180] sm:$0xff] }
  0xb2   :  { %758 = vmatprep.subr.mxu0 %v726_v20  ;;  %829 = vmatprep.subr.mxu1 %v728_v23  ;;  %v668_v20 = vld [vmem:[#allocation11 + $0x198] sm:$0xff]  ;;  %v662_v23 = vld [vmem:[#allocation11 + $0x168] sm:$0xff] }
  0xb3   :  { %759 = vmatpush1.msra.mxu0 %v725_v22  ;;  %830 = vmatpush1.msra.mxu1 %v727_v25  ;;  %v667_v22 = vld [vmem:[#allocation11 + $0x190] sm:$0xff]  ;;  %v661_v25 = vld [vmem:[#allocation11 + $0x160] sm:$0xff] }
  0xb4   :  { %760 = vmatprep.subr.mxu0 %v722_v24  ;;  %831 = vmatprep.subr.mxu1 %v724_v27  ;;  %v664_v24 = vld [vmem:[#allocation11 + $0x178] sm:$0xff]  ;;  %v658_v27 = vld [vmem:[#allocation11 + $0x148] sm:$0xff] }
  0xb5   :  { %761 = vmatpush1.msra.mxu0 %v721_v26  ;;  %832 = vmatpush1.msra.mxu1 %v723_v29  ;;  %v663_v26 = vld [vmem:[#allocation11 + $0x170] sm:$0xff]  ;;  %v657_v29 = vld [vmem:[#allocation11 + $0x140] sm:$0xff] }
  0xb6   :  { %762 = vmatprep.subr.mxu0 %v718_v28  ;;  %833 = vmatprep.subr.mxu1 %v720_v31  ;;  %v660_v28 = vld [vmem:[#allocation11 + $0x158] sm:$0xff]  ;;  %v654_v31 = vld [vmem:[#allocation11 + $0x128] sm:$0xff] }
  0xb7   :  { %763 = vmatpush1.msra.mxu0 %v717_v30  ;;  %834 = vmatpush1.msra.mxu1 %v719_v33  ;;  %v659_v30 = vld [vmem:[#allocation11 + $0x150] sm:$0xff]  ;;  %v653_v33 = vld [vmem:[#allocation11 + $0x120] sm:$0xff] }
  0xb8   :  { %764 = vmatprep.subr.mxu0 %v714_v32  ;;  %835 = vmatprep.subr.mxu1 %v716_v35  ;;  %v656_v32 = vld [vmem:[#allocation11 + $0x138] sm:$0xff]  ;;  %v650_v35 = vld [vmem:[#allocation11 + $0x108] sm:$0xff] }
  0xb9   :  { %765 = vmatpush1.msra.mxu0 %v713_v34  ;;  %836 = vmatpush1.msra.mxu1 %v715_v37  ;;  %v655_v34 = vld [vmem:[#allocation11 + $0x130] sm:$0xff]  ;;  %v649_v37 = vld [vmem:[#allocation11 + $0x100] sm:$0xff] }
  0xba   :  { %766 = vmatprep.subr.mxu0 %v710_v36  ;;  %837 = vmatprep.subr.mxu1 %v712_v39  ;;  %v652_v36 = vld [vmem:[#allocation11 + $0x118] sm:$0xff]  ;;  %v646_v39 = vld [vmem:[#allocation11 + $0xe8] sm:$0xff] }
  0xbb   :  { %767 = vmatpush1.msra.mxu0 %v709_v38  ;;  %838 = vmatpush1.msra.mxu1 %v711_v41  ;;  %v651_v38 = vld [vmem:[#allocation11 + $0x110] sm:$0xff]  ;;  %v645_v41 = vld [vmem:[#allocation11 + $0xe0] sm:$0xff] }
  0xbc   :  { %768 = vmatprep.subr.mxu0 %v706_v40  ;;  %839 = vmatprep.subr.mxu1 %v708_v43  ;;  %v648_v40 = vld [vmem:[#allocation11 + $0xf8] sm:$0xff]  ;;  %v642_v43 = vld [vmem:[#allocation11 + $0xc8] sm:$0xff] }
  0xbd   :  { %769 = vmatpush1.msra.mxu0 %v705_v42  ;;  %840 = vmatpush1.msra.mxu1 %v707_v45  ;;  %v647_v42 = vld [vmem:[#allocation11 + $0xf0] sm:$0xff]  ;;  %v641_v45 = vld [vmem:[#allocation11 + $0xc0] sm:$0xff] }
  0xbe   :  { %770 = vmatprep.subr.mxu0 %v702_v44  ;;  %841 = vmatprep.subr.mxu1 %v704_v47  ;;  %v644_v44 = vld [vmem:[#allocation11 + $0xd8] sm:$0xff]  ;;  %v638_v47 = vld [vmem:[#allocation11 + $0xa8] sm:$0xff] }
  0xbf   :  { %771 = vmatpush1.msra.mxu0 %v701_v46  ;;  %842 = vmatpush1.msra.mxu1 %v703_v49  ;;  %v643_v46 = vld [vmem:[#allocation11 + $0xd0] sm:$0xff]  ;;  %v637_v49 = vld [vmem:[#allocation11 + $0xa0] sm:$0xff] }
  0xc0   :  { %772 = vmatprep.subr.mxu0 %v698_v48  ;;  %843 = vmatprep.subr.mxu1 %v700_v51  ;;  %v640_v48 = vld [vmem:[#allocation11 + $0xb8] sm:$0xff]  ;;  %v634_v51 = vld [vmem:[#allocation11 + $0x88] sm:$0xff] }
  0xc1   :  { %773 = vmatpush1.msra.mxu0 %v697_v50  ;;  %844 = vmatpush1.msra.mxu1 %v699_v53  ;;  %v639_v50 = vld [vmem:[#allocation11 + $0xb0] sm:$0xff]  ;;  %v633_v53 = vld [vmem:[#allocation11 + $0x80] sm:$0xff] }
  0xc2   :  { %774 = vmatprep.subr.mxu0 %v694_v52  ;;  %845 = vmatprep.subr.mxu1 %v696_v55  ;;  %v636_v52 = vld [vmem:[#allocation11 + $0x98] sm:$0xff]  ;;  %v630_v55 = vld [vmem:[#allocation11 + $0x68] sm:$0xff] }
  0xc3   :  { %775 = vmatpush1.msra.mxu0 %v693_v54  ;;  %846 = vmatpush1.msra.mxu1 %v695_v57  ;;  %v635_v54 = vld [vmem:[#allocation11 + $0x90] sm:$0xff]  ;;  %v629_v57 = vld [vmem:[#allocation11 + $0x60] sm:$0xff] }
  0xc4   :  { %776 = vmatprep.subr.mxu0 %v690_v56  ;;  %847 = vmatprep.subr.mxu1 %v692_v59  ;;  %v632_v56 = vld [vmem:[#allocation11 + $0x78] sm:$0xff]  ;;  %v626_v59 = vld [vmem:[#allocation11 + $0x48] sm:$0xff] }
  0xc5   :  { %777 = vmatpush1.msra.mxu0 %v689_v58  ;;  %848 = vmatpush1.msra.mxu1 %v691_v61  ;;  %v631_v58 = vld [vmem:[#allocation11 + $0x70] sm:$0xff]  ;;  %v625_v61 = vld [vmem:[#allocation11 + $0x40] sm:$0xff] }
  0xc6   :  { %778 = vmatprep.subr.mxu0 %v686_v60  ;;  %849 = vmatprep.subr.mxu1 %v688_v63  ;;  %v628_v60 = vld [vmem:[#allocation11 + $0x58] sm:$0xff]  ;;  %v622_v63 = vld [vmem:[#allocation11 + $0x28] sm:$0xff] }
  0xc7   :  { %779 = vmatpush1.msra.mxu0 %v685_v62  ;;  %850 = vmatpush1.msra.mxu1 %v687_v2  ;;  %v627_v62 = vld [vmem:[#allocation11 + $0x50] sm:$0xff]  ;;  %v621_v2 = vld [vmem:[#allocation11 + $0x20] sm:$0xff] }
  0xc8   :  { %780 = vmatprep.subr.mxu0 %v682_v1  ;;  %851 = vmatprep.subr.mxu1 %v684_v4  ;;  %v624_v1 = vld [vmem:[#allocation11 + $0x38] sm:$0xff]  ;;  %v618_v4 = vld [vmem:[#allocation11 + $0x8] sm:$0xff] }
  0xc9   :  { %781 = vmatpush1.msra.mxu0 %v681_v3  ;;  %852 = vmatpush1.msra.mxu1 %v683_v6  ;;  %v623_v3 = vld [vmem:[#allocation11 + $0x30] sm:$0xff]  ;;  %v617_v6 = vld [vmem:[#allocation11] sm:$0xff] }
  0xca   :  { %815 = vmatmul.mubr.f32.vlgmr.msra.gmra.mxu0 %v747_v5  ;;  %892 = vmatprep.subr.mxu0 %v678_v7  ;;  %v619_v7 = vld [vmem:[#allocation11 + $0x10] sm:$0xff] }
  0xcb   :  { %963 = vmatprep.subr.mxu1 %v680_v8  ;;  %886 = vmatmul.mubr.f32.vlgmr.msra.gmra.mxu1 %v747_v5  ;;  %v620_v5 = vld [vmem:[#allocation11 + $0x18] sm:$0xff]  ;;  %v567_v8 = vlaneseq }
  0xcc   :  { %893 = vmatpush1.msra.mxu0 %v677_v9  ;;  %964 = vmatpush1.msra.mxu1 %v679_v10 }
  0xcd   :  { %894 = vmatprep.subr.mxu0 %v674_v11  ;;  %965 = vmatprep.subr.mxu1 %v676_v12  ;;  %v1713_v9 = vshrl.u32 %v567_v8, 7  ;;  %v279_v12 = vld [vmem:[%s1780_s5] sm:$0xf] }
  0xce   :  { %895 = vmatpush1.msra.mxu0 %v673_v13  ;;  %966 = vmatpush1.msra.mxu1 %v675_v14  ;;  %v745_v8 = vld [vmem:[%s1783_s8] sm:$0xf]  ;;  %s1589_s8 = smov [#allocation17]  }
  0xcf   :  { %896 = vmatprep.subr.mxu0 %v670_v15  ;;  %967 = vmatprep.subr.mxu1 %v672_v16  ;;  %v569_v11 = vsub.s32 0, %v1713_v9  ;;  %v573_v14 = vsub.s32 1, %v1713_v9  ;;  %s1196_s16 = sshll.u32 %s1589_s8, 4  ;;  %s1197_s16 = int_to_ptr.vmem [resolvable:$true] %s1196_s16 }
  0xd0   :  { %897 = vmatpush1.msra.mxu0 %v669_v17  ;;  %968 = vmatpush1.msra.mxu1 %v671_v18  ;;  %s1500_s17 = scalar_lea.vmem %s1197_s16, 64  ;;  %p1505_p13 = scmp.lt.s32.totalorder %s1197_s16, %s1197_s16 }
  0xd1   :  { %898 = vmatprep.subr.mxu0 %v666_v19  ;;  %969 = vmatprep.subr.mxu1 %v668_v20  ;;  %v570_v16 = vrot.slane %v279_v12, %v569_v11  ;;  %v574_v20 = vrot.slane %v279_v12, %v573_v14  ;;  %p1501_p12 = scmp.ne.s32.totalorder %s1197_s16, %s1500_s17  ;;  %p1506_p0 = scmp.lt.s32.totalorder %s1500_s17, %s1500_s17 }
  0xd2   :  { %899 = vmatpush1.msra.mxu0 %v665_v21  ;;  %970 = vmatpush1.msra.mxu1 %v667_v22 }
  0xd3   :  { %900 = vmatprep.subr.mxu0 %v662_v23  ;;  %971 = vmatprep.subr.mxu1 %v664_v24  ;;  %p1507_p1 = por %p1506_p0, %p1505_p13 }
  0xd4   :  { %901 = vmatpush1.msra.mxu0 %v661_v25  ;;  %972 = vmatpush1.msra.mxu1 %v663_v26 }
  0xd5   :  { %902 = vmatprep.subr.mxu0 %v658_v27  ;;  %973 = vmatprep.subr.mxu1 %v660_v28  ;;  %v581_v27 = vsub.s32 3, %v1713_v9  ;;  %p1508_p2 = pnand %p1507_p1, %p1501_p12 }
  0xd6   :  { %903 = vmatpush1.msra.mxu0 %v657_v29  ;;  %974 = vmatpush1.msra.mxu1 %v659_v30 }
  0xd7   :  { %904 = vmatprep.subr.mxu0 %v654_v31  ;;  %975 = vmatprep.subr.mxu1 %v656_v32  ;;  %v582_v31 = vrot.slane %v279_v12, %v581_v27  ;;  %v577_v32 = vsub.s32 2, %v1713_v9 }
  0xd8   :  { %905 = vmatpush1.msra.mxu0 %v653_v33  ;;  %976 = vmatpush1.msra.mxu1 %v655_v34 }
  0xd9   :  { %906 = vmatprep.subr.mxu0 %v650_v35  ;;  %977 = vmatprep.subr.mxu1 %v652_v36  ;;  %v578_v35 = vrot.slane %v279_v12, %v577_v32 }
  0xda   :  { %907 = vmatpush1.msra.mxu0 %v649_v37  ;;  %978 = vmatpush1.msra.mxu1 %v651_v38 }
  0xdb   :  { %908 = vmatprep.subr.mxu0 %v646_v39  ;;  %979 = vmatprep.subr.mxu1 %v648_v40 }
  0xdc   :  { %909 = vmatpush1.msra.mxu0 %v645_v41  ;;  %980 = vmatpush1.msra.mxu1 %v647_v42 }
  0xdd   :  { %910 = vmatprep.subr.mxu0 %v642_v43  ;;  %981 = vmatprep.subr.mxu1 %v644_v44  ;;  %v281_v44 = vld [vmem:[#allocation7] sm:$0x3] }
  0xde   :  { %911 = vmatpush1.msra.mxu0 %v641_v45  ;;  %982 = vmatpush1.msra.mxu1 %v643_v46 }
  0xdf   :  { %912 = vmatprep.subr.mxu0 %v638_v47  ;;  %983 = vmatprep.subr.mxu1 %v640_v48 }
  0xe0   :  { %913 = vmatpush1.msra.mxu0 %v637_v49  ;;  %984 = vmatpush1.msra.mxu1 %v639_v50 }
  0xe1   :  { %914 = vmatprep.subr.mxu0 %v634_v51  ;;  %985 = vmatprep.subr.mxu1 %v636_v52 }
  0xe2   :  { %915 = vmatpush1.msra.mxu0 %v633_v53  ;;  %986 = vmatpush1.msra.mxu1 %v635_v54  ;;  %v1102_v54 = vld [vmem:[#allocation14 + $0x78] sm:$0xff] }
  0xe3   :  { %916 = vmatprep.subr.mxu0 %v630_v55  ;;  %987 = vmatprep.subr.mxu1 %v632_v56  ;;  %v1101_v55 = vld [vmem:[#allocation14 + $0x70] sm:$0xff]  ;;  %v1100_v56 = vld [vmem:[#allocation14 + $0x68] sm:$0xff] }
  0xe4   :  { %917 = vmatpush1.msra.mxu0 %v629_v57  ;;  %988 = vmatpush1.msra.mxu1 %v631_v58  ;;  %v1099_v57 = vld [vmem:[#allocation14 + $0x60] sm:$0xff]  ;;  %v1098_v58 = vld [vmem:[#allocation14 + $0x58] sm:$0xff] }
  0xe5   :  { %918 = vmatprep.subr.mxu0 %v626_v59  ;;  %989 = vmatprep.subr.mxu1 %v628_v60  ;;  %v1097_v59 = vld [vmem:[#allocation14 + $0x50] sm:$0xff]  ;;  %v1096_v60 = vld [vmem:[#allocation14 + $0x48] sm:$0xff] }
  0xe6   :  { %919 = vmatpush1.msra.mxu0 %v625_v61  ;;  %990 = vmatpush1.msra.mxu1 %v627_v62  ;;  %v1095_v61 = vld [vmem:[#allocation14 + $0x40] sm:$0xff]  ;;  %v1094_v62 = vld [vmem:[#allocation14 + $0x38] sm:$0xff] }
  0xe7   :  { %920 = vmatprep.subr.mxu0 %v622_v63  ;;  %991 = vmatprep.subr.mxu1 %v624_v1  ;;  %v1093_v63 = vld [vmem:[#allocation14 + $0x30] sm:$0xff]  ;;  %v1092_v1 = vld [vmem:[#allocation14 + $0x28] sm:$0xff] }
  0xe8   :  { %921 = vmatpush1.msra.mxu0 %v621_v2  ;;  %992 = vmatpush1.msra.mxu1 %v623_v3  ;;  %v1091_v2 = vld [vmem:[#allocation14 + $0x20] sm:$0xff]  ;;  %v1090_v3 = vld [vmem:[#allocation14 + $0x18] sm:$0xff] }
  0xe9   :  { %922 = vmatprep.subr.mxu0 %v618_v4  ;;  %993 = vmatprep.subr.mxu1 %v620_v5  ;;  %v1089_v4 = vld [vmem:[#allocation14 + $0x10] sm:$0xff]  ;;  %v1088_v5 = vld [vmem:[#allocation14 + $0x8] sm:$0xff] }
  0xea   :  { %923 = vmatpush1.msra.mxu0 %v617_v6  ;;  %956 = vmatprep.mubr.f32.mxu0 %v1587_v0  ;;  %v1087_v6 = vld [vmem:[#allocation14] sm:$0xff] }
  0xeb   :  { %994 = vmatpush1.msra.mxu1 %v619_v7  ;;  %1027 = vmatprep.mubr.f32.mxu1 %v1587_v0 }
  0xec   :  { %1255 = vmatprep.subr.mxu0 %v1587_v0 }
 0x146   :  { %v348_v10 = vpop.f32.mrf.mxu0 }
 0x147   :  { %v419_v13 = vpop.f32.mrf.mxu1 }
 0x148   :  { %v350_v15 = vpop.f32.mrf.mxu0 }
 0x149   :  { %v421_v18 = vpop.f32.mrf.mxu1 }
 0x168   :  { %v490_v17 = vpop.f32.mrf.mxu0  ;;  %v561_v23 = vpop.f32.mrf.mxu1 }
 0x169   :  { %v491_v19 = vadd.f32 %v490_v17, %v348_v10  ;;  %v562_v34 = vadd.f32 %v561_v23, %v419_v13  ;;  %v1038_v13 = vrot.slane %v745_v8, %v569_v11  ;;  %v1050_v11 = vrot.slane %v745_v8, %v581_v27 }
 0x16a   :  { %v492_v21 = vpop.f32.mrf.mxu0  ;;  %v563_v29 = vpop.f32.mrf.mxu1 }
 0x16b   :  { %v587_v22 = vadd.f32 %v570_v16, %v491_v19  ;;  %v493_v24 = vadd.f32 %v492_v21, %v350_v15  ;;  %v564_v30 = vadd.f32 %v563_v29, %v421_v18  ;;  %v589_v38 = vadd.f32 %v578_v35, %v562_v34 }
 0x16c   :  { %v1042_v18 = vrot.slane %v745_v8, %v573_v14 }
 0x16d   :  { %v1231_v25 = vmul.f32 -1.442695, %v587_v22  ;;  %v588_v26 = vadd.f32 %v574_v20, %v493_v24  ;;  %v590_v33 = vadd.f32 %v582_v31, %v564_v30  ;;  %v1046_v30 = vrot.slane %v745_v8, %v577_v32 }
 0x16f   :  { %1308 = vpow2.f32 %v1231_v25  ;;  %v1232_v28 = vmul.f32 -1.442695, %v588_v26  ;;  %v1233_v36 = vmul.f32 -1.442695, %v590_v33 }
 0x171   :  { %1310 = vpow2.f32 %v1232_v28 }
 0x172   :  { %1312 = vpow2.f32 %v1233_v36 }
 0x17c   :  { %v1309_v37 = vpop.eup %1308 }
 0x17d   :  { %v594_v39 = vadd.f32 1.0, %v1309_v37 }
 0x17e   :  { %v1311_v40 = vpop.eup %1310 }
 0x17f   :  { %1314 = vrcp.f32 %v594_v39  ;;  %v600_v41 = vadd.f32 1.0, %v1311_v40  ;;  %v1313_v42 = vpop.eup %1312  ;;  %v749_v39 = vld [vmem:[#allocation7 + $0x2] sm:$0x3] }
 0x180   :  { %1316 = vtanh.f32 %v589_v38  ;;  %v607_v47 = vadd.f32 1.0, %v1313_v42 }
 0x181   :  { %1318 = vrcp.f32 %v600_v41 }
 0x182   :  { %1320 = vrcp.f32 %v607_v47 }
 0x18a   :  { %v816_v7 = vpop.f32.mrf.mxu0 }
 0x18b   :  { %v887_v10 = vpop.f32.mrf.mxu1 }
 0x18c   :  { %v1315_v43 = vpop.eup %1314  ;;  %v818_v12 = vpop.f32.mrf.mxu0 }
 0x18d   :  { %v1317_v45 = vpop.eup %1316  ;;  %v889_v16 = vpop.f32.mrf.mxu1 }
 0x18e   :  { %v1319_v46 = vpop.eup %1318  ;;  %v611_v48 = vmul.f32 %v1317_v45, %v1315_v43 }
 0x18f   :  { %v610_v49 = vmul.f32 %v1319_v46, %v281_v44  ;;  %v1321_v51 = vpop.eup %1320 }
 0x191   :  { %v612_v50 = vadd.f32 %v611_v48, %v610_v49 }
 0x193   :  { %1322 = vtanh.f32 %v612_v50  ;;  %616 = vst [vmem:[#allocation19] sm:$0x3] %v612_v50 }
 0x1a0   :  { %v1323_v52 = vpop.eup %1322 }
 0x1a1   :  { %v614_v53 = vmul.f32 %v1323_v52, %v1321_v51 }
 0x1a3   :  { %957 = vmatmul.mubr.f32.vlgmr.msra.gmra.mxu0 %v614_v53  ;;  %615 = vst [vmem:[#allocation17] sm:$0x3] %v614_v53  ;;  %1028 = vmatmul.mubr.f32.vlgmr.msra.gmra.mxu1 %v614_v53 }
 0x1a4   :  { %1256 = vmatpush3.msra.mxu0 %v1102_v54  ;;  %1287 = vmatprep.mubr.msk.f32.mxu0 %vm1588_vm0, %v1587_v0 }
 0x1a5   :  { %1257 = vmatprep.subr.mxu0 %v1587_v0 }
 0x1a6   :  { %1258 = vmatpush3.msra.mxu0 %v1101_v55 }
 0x1a7   :  { %1259 = vmatprep.subr.mxu0 %v1587_v0 }
 0x1a8   :  { %1260 = vmatpush3.msra.mxu0 %v1100_v56 }
 0x1a9   :  { %1261 = vmatprep.subr.mxu0 %v1587_v0 }
 0x1aa   :  { %1262 = vmatpush3.msra.mxu0 %v1099_v57 }
 0x1ab   :  { %1263 = vmatprep.subr.mxu0 %v1587_v0 }
 0x1ac   :  { %1264 = vmatpush3.msra.mxu0 %v1098_v58 }
 0x1ad   :  { %1265 = vmatprep.subr.mxu0 %v1587_v0 }
 0x1ae   :  { %1266 = vmatpush3.msra.mxu0 %v1097_v59 }
 0x1af   :  { %1267 = vmatprep.subr.mxu0 %v1587_v0 }
 0x1b0   :  { %1268 = vmatpush3.msra.mxu0 %v1096_v60 }
 0x1b1   :  { %1269 = vmatprep.subr.mxu0 %v1587_v0 }
 0x1b2   :  { %1270 = vmatpush3.msra.mxu0 %v1095_v61 }
 0x1b3   :  { %1271 = vmatprep.subr.mxu0 %v1587_v0 }
 0x1b4   :  { %1272 = vmatpush3.msra.mxu0 %v1094_v62 }
 0x1b5   :  { %1273 = vmatprep.subr.mxu0 %v1587_v0 }
 0x1b6   :  { %1274 = vmatpush3.msra.mxu0 %v1093_v63 }
 0x1b7   :  { %1275 = vmatprep.subr.mxu0 %v1587_v0 }
 0x1b8   :  { %1276 = vmatpush3.msra.mxu0 %v1092_v1 }
 0x1b9   :  { %1277 = vmatprep.subr.mxu0 %v1587_v0 }
 0x1ba   :  { %1278 = vmatpush3.msra.mxu0 %v1091_v2 }
 0x1bb   :  { %1279 = vmatprep.subr.mxu0 %v1587_v0 }
 0x1bc   :  { %1280 = vmatpush3.msra.mxu0 %v1090_v3 }
 0x1bd   :  { %1281 = vmatprep.subr.mxu0 %v1587_v0 }
 0x1be   :  { %1282 = vmatpush3.msra.mxu0 %v1089_v4 }
 0x1bf   :  { %1283 = vmatprep.subr.mxu0 %v1587_v0 }
 0x1c0   :  { %1284 = vmatpush3.msra.mxu0 %v1088_v5 }
 0x1c1   :  { %1285 = vmatprep.subr.mxu0 %v1587_v0 }
 0x1c2   :  { %1286 = vmatpush3.msra.mxu0 %v1087_v6 }
 0x263   :  { %v958_v15 = vpop.f32.mrf.mxu0  ;;  %v1029_v0 = vpop.f32.mrf.mxu1 }
 0x264   :  { %v959_v17 = vadd.f32 %v958_v15, %v816_v7  ;;  %v1030_v29 = vadd.f32 %v1029_v0, %v887_v10 }
 0x265   :  { %v960_v19 = vpop.f32.mrf.mxu0  ;;  %v1031_v25 = vpop.f32.mrf.mxu1 }
 0x266   :  { %v1055_v20 = vadd.f32 %v1038_v13, %v959_v17  ;;  %v961_v21 = vadd.f32 %v960_v19, %v818_v12  ;;  %v1032_v26 = vadd.f32 %v1031_v25, %v889_v16  ;;  %v1057_v33 = vadd.f32 %v1046_v30, %v1030_v29 }
 0x268   :  { %v1234_v22 = vmul.f32 -1.442695, %v1055_v20  ;;  %v1056_v23 = vadd.f32 %v1042_v18, %v961_v21  ;;  %v1058_v28 = vadd.f32 %v1050_v11, %v1032_v26 }
 0x26a   :  { %1324 = vpow2.f32 %v1234_v22  ;;  %v1235_v24 = vmul.f32 -1.442695, %v1056_v23  ;;  %v1236_v14 = vmul.f32 -1.442695, %v1058_v28 }
 0x26c   :  { %1326 = vpow2.f32 %v1235_v24 }
 0x26d   :  { %1328 = vpow2.f32 %v1236_v14 }
 0x277   :  { %v1325_v31 = vpop.eup %1324 }
 0x278   :  { %v1062_v34 = vadd.f32 1.0, %v1325_v31 }
 0x279   :  { %v1327_v35 = vpop.eup %1326 }
 0x27a   :  { %1330 = vrcp.f32 %v1062_v34  ;;  %v1068_v36 = vadd.f32 1.0, %v1327_v35  ;;  %v1329_v37 = vpop.eup %1328 }
 0x27b   :  { %1332 = vtanh.f32 %v1057_v33  ;;  %v1075_v41 = vadd.f32 1.0, %v1329_v37 }
 0x27c   :  { %1334 = vrcp.f32 %v1068_v36 }
 0x27d   :  { %1336 = vrcp.f32 %v1075_v41 }
 0x287   :  { %v1331_v38 = vpop.eup %1330 }
 0x288   :  { %v1333_v40 = vpop.eup %1332 }
 0x289   :  { %v1335_v27 = vpop.eup %1334  ;;  %v1079_v42 = vmul.f32 %v1333_v40, %v1331_v38 }
 0x28a   :  { %v1078_v43 = vmul.f32 %v1335_v27, %v749_v39  ;;  %v1337_v32 = vpop.eup %1336 }
 0x28c   :  { %v1080_v9 = vadd.f32 %v1079_v42, %v1078_v43 }
 0x28e   :  { %1338 = vtanh.f32 %v1080_v9  ;;  %1086 = vst [vmem:[#allocation19 + $0x2] sm:$0x3] %v1080_v9 }
 0x29b   :  { %v1339_v44 = vpop.eup %1338 }
 0x29c   :  { %v1082_v45 = vmul.f32 %v1339_v44, %v1337_v32 }
 0x29e   :  { %1288 = vmatmul.mubr.f32.vlgmr.msra.gmra.mxu0 %v1082_v45  ;;  %1084 = vst [vmem:[#allocation17 + $0x2] sm:$0x3] %v1082_v45 }
 0x29f   :  { %1511 = shalt.err (!%p1508_p2)
}
 0x2a0   :  { %1202 = dma.vmem_to_hbm [thread:$0]  %s1197_s16, 64, %s1787_s12, [#allocation18], %s1575_s28, %s1575_s28, %s1576_s29  }
 0x2a1   :  { %s1590_s20 = smov [#allocation19]  }
 0x2a2   :  { %s1208_s0 = sshll.u32 %s1590_s20, 4  ;;  %s1209_s0 = int_to_ptr.vmem [resolvable:$true] %s1208_s0 }
 0x2a3   :  { %s1520_s21 = scalar_lea.vmem %s1209_s0, 64  ;;  %p1525_p4 = scmp.lt.s32.totalorder %s1209_s0, %s1209_s0 }
 0x2a4   :  { %p1521_p3 = scmp.ne.s32.totalorder %s1209_s0, %s1520_s21  ;;  %p1526_p5 = scmp.lt.s32.totalorder %s1520_s21, %s1520_s21 }
 0x2a6   :  { %p1527_p6 = por %p1526_p5, %p1525_p4 }
 0x2a8   :  { %p1528_p7 = pnand %p1527_p6, %p1521_p3 }
 0x2aa   :  { %1531 = shalt.err (!%p1528_p7)
}
 0x2ab   :  { %1214 = dma.vmem_to_hbm [thread:$0]  %s1209_s0, 64, %s1788_s13, [#allocation18], %s1575_s28, %s1575_s28, %s1576_s29  }
 0x2ac   :  { %v1237_v46 = vld [vmem:[%s1785_s10] ss:$0 sm:$0xff]  ;;  %s1591_s12 = smov [#allocation16]  }
 0x2ad   :  { %s1187_s2 = sshll.u32 %s1591_s12, 4  ;;  %s1188_s2 = int_to_ptr.vmem [resolvable:$true] %s1187_s2 }
 0x2ae   :  { %s1540_s25 = scalar_lea.vmem %s1188_s2, 32  ;;  %p1545_p9 = scmp.lt.s32.totalorder %s1188_s2, %s1188_s2 }
 0x2af   :  { %p1541_p8 = scmp.ne.s32.totalorder %s1188_s2, %s1540_s25  ;;  %p1546_p10 = scmp.lt.s32.totalorder %s1540_s25, %s1540_s25 }
 0x2b1   :  { %p1547_p11 = por %p1546_p10, %p1545_p9 }
 0x2b3   :  { %p1548_p12 = pnand %p1547_p11, %p1541_p8 }
 0x35e   :  { %v1176_v47 = vpop.f32.mrf.mxu0 }
 0x35f   :  { %v1177_v48 = vadd.f32 %v1237_v46, %v1176_v47 }
 0x360   :  { %v1289_v49 = vpop.f32.mrf.mxu0 }
 0x361   :  { %1180 = vst [vmem:[#allocation16] sm:$0x3] %v1177_v48 }
 0x362   :  { %1551 = shalt.err (!%p1548_p12)
}
 0x363   :  { %1190 = dma.vmem_to_hbm [thread:$0]  %s1188_s2, 32, %s1786_s11, [#allocation4]  }
 0x364   :  { %1570 = dma.done.wait [#allocation4], 32  }
 0x365   :  { %1571 = vsyncadd [#allocation4], 4294967264 }
 0x366   :  { %1572 = dma.done.wait [#allocation18], 128  }
 0x367   :  { %1573 = vsyncadd [#allocation18], 4294967168 }
 0x368   :  { %1224 = vsyncpa [#allocation3], 1 }
 0x369   :  { %1225 = vsyncpa [#allocation6], 1 }
 0x36a   :  { %1226 = vsyncpa [#allocation9], 1 }
 0x36b   :  { %1227 = vsyncpa [#allocation12], 1 }
 0x36c   :  { %1228 = vsyncpa [#allocation15], 1 }
 0x36d   :  { %1229 = vsyncpa [#allocation4], 1 }
 0x36e   :  { %1230 = vsyncpa [#allocation18], 1 }

</bundles_post_ra>
